<compile_context>
chip_gen: v7x
topology: tpu7x:2x2x1
jax: 0.10.0
libtpu: 0.0.40
codegen_flags: <defaults>
</compile_context>

<pallas_src>
import numpy as np
import jax
import jax.numpy as jnp
from jax import lax
from jax.experimental import pallas as pl
from jax.experimental.pallas import tpu as pltpu

EPS = 1e-5
NEG_SLOPE = 0.2


# ----------------------------------------------------------------------------
# One-time weight re-layout (setup, not in the hot path)
# ----------------------------------------------------------------------------
def _prepare_kernel_params(params, N, H, W):
    w1, wup, w2, g1, b1, g2, b2, g3, b3 = params
    Ci, Co = w1.shape[2], w1.shape[3]
    C4 = 4 * Co

    w1n = np.asarray(w1, np.float32)
    wupn = np.asarray(wup, np.float32)
    w2n = np.asarray(w2, np.float32)

    # conv1 (5x5, pad 2) as one banded matmul on the width-folded layout.
    #   LHS rows (n, h), LHS cols (dh, wp, ci);  RHS cols (w, co); dw = wp - w.
    W1 = np.zeros((5 * (W + 4) * Ci, W * Co), np.float32)
    for dh in range(5):
        for w in range(W):
            for dw in range(5):
                wp = w + dw
                r0 = (dh * (W + 4) + wp) * Ci
                W1[r0:r0 + Ci, w * Co:(w + 1) * Co] = w1n[dh, dw]

    # ConvTranspose2d(k=2, s=2, bias=False) as a block-diagonal matmul:
    #   (w, c) -> (w, i, j, d)
    blk = np.transpose(wupn, (0, 2, 3, 1)).reshape(Co, C4)        # [(c), (i, j, d)]
    WU = np.zeros((W * Co, W * C4), np.float32)
    for w in range(W):
        WU[w * Co:(w + 1) * Co, w * C4:(w + 1) * C4] = blk

    # conv2 (5x5, pad 2) applied to the *phase-blocked* upsampled layout, as one
    # banded matmul.  LHS rows (n, h'); LHS cols (rb, wb, ri, ci, d);
    # RHS cols (w', i', j', e) with dh = 2*rb + ri - i', dw = 2*(wb - w') + ci - j'.
    W2 = np.zeros((3 * (W + 2) * C4, W * C4), np.float32)
    for rb in range(3):
        for ri in range(2):
            for ip in range(2):
                dh = 2 * rb + ri - ip
                if not 0 <= dh <= 4:
                    continue
                for wb in range(W + 2):
                    for ci in range(2):
                        for jp in range(2):
                            for wq in range(W):
                                dw = 2 * (wb - wq) + ci - jp
                                if not 0 <= dw <= 4:
                                    continue
                                r0 = (rb * (W + 2) + wb) * C4 + (ri * 2 + ci) * Co
                                c0 = wq * C4 + (ip * 2 + jp) * Co
                                W2[r0:r0 + Co, c0:c0 + Co] = w2n[dh, dw]

    # Channel-group matrices for the BN batch statistics (1/count folded in).
    def gmat(C, nch, count):
        idx = np.arange(C)
        g = ((idx[:, None] % nch) == (idx[None, :] % nch)).astype(np.float32)
        return jnp.asarray(g / count)

    kp = dict(
        w1=jnp.asarray(W1, jnp.bfloat16),          # bf16 MXU operands (f32 accumulate)
        wup=jnp.asarray(WU, jnp.float32),          # block-diagonal, kept exact
        w2=jnp.asarray(W2, jnp.bfloat16),
        gd1=gmat(W * Ci, Ci, N * H * W),
        gd2=gmat(W * Co, Co, N * H * W),
        gd3=gmat(W * C4, Co, N * H * W * 4),
        g1=jnp.tile(jnp.asarray(g1, jnp.float32), (1, W)),
        b1=jnp.tile(jnp.asarray(b1, jnp.float32), (1, W)),
        g2=jnp.tile(jnp.asarray(g2, jnp.float32), (1, W)),
        b2=jnp.tile(jnp.asarray(b2, jnp.float32), (1, W)),
        g3=jnp.tile(jnp.asarray(g3, jnp.float32), (1, 4 * W)),
        b3=jnp.tile(jnp.asarray(b3, jnp.float32), (1, 4 * W)),
    )
    return kp, Ci, Co


# ----------------------------------------------------------------------------
# Fused Pallas kernel + jitted wrapper
# ----------------------------------------------------------------------------
def make_decoder_forward(params, N, H, W):
    kp, Ci, Co = _prepare_kernel_params(params, N, H, W)
    C1 = W * Ci            # folded input lanes       (128 at the test size)
    C4 = 4 * Co
    C3 = W * C4            # folded upsampled lanes   (256)
    Wp1 = (W + 4) * Ci     # padded conv1 row width   (160)
    Wp2 = (W + 2) * C4     # padded conv2 row width   (288)
    R = N * H              # matmul rows              (32)

    def kernel(x_ref, w1_ref, wup_ref, w2_ref,
               gd1_ref, gd2_ref, gd3_ref,
               g1_ref, b1_ref, g2_ref, b2_ref, g3_ref, b3_ref,
               out_ref, pad1_ref, zpad_ref):
        f32 = jnp.float32
        bf16 = jnp.bfloat16

        def bn(a, gd_ref, g_ref, b_ref):
            # training-mode BatchNorm on a lane-folded (rows, W*ch) matrix:
            # sublane row-sum + tiny matmul against the channel-group matrix
            # (1/count pre-folded).  Statistics stay in f32, two-pass variance.
            colsum = jnp.sum(a, axis=0, keepdims=True)
            mean_b = jnp.dot(colsum, gd_ref[...], preferred_element_type=f32)
            xc = a - mean_b
            sq = jnp.sum(xc * xc, axis=0, keepdims=True)
            var_b = jnp.dot(sq, gd_ref[...], preferred_element_type=f32)
            return xc * lax.rsqrt(var_b + EPS) * g_ref[...] + b_ref[...]

        # ---- BN1 on the lane-dense folded input (R, W*Ci) ----
        x = x_ref[...].reshape(R, C1)
        xn = bn(x, gd1_ref, g1_ref, b1_ref)

        # ---- conv1: zero only the 2-pixel halo, store the interior once ----
        pad1_ref[:, 0:2, :] = jnp.zeros((N, 2, Wp1), f32)
        pad1_ref[:, H + 2:H + 4, :] = jnp.zeros((N, 2, Wp1), f32)
        pad1_ref[:, 2:H + 2, 0:2 * Ci] = jnp.zeros((N, H, 2 * Ci), f32)
        pad1_ref[:, 2:H + 2, (2 + W) * Ci:(4 + W) * Ci] = jnp.zeros((N, H, 2 * Ci), f32)
        pad1_ref[:, 2:H + 2, 2 * Ci:(2 + W) * Ci] = xn.reshape(N, H, C1)

        # im2col needs only 5 full-lane, sublane-shifted slices (one per dh);
        # a single banded matmul replaces the 25 per-tap K=8 matmuls.
        im1 = jnp.concatenate(
            [pad1_ref[:, dh:dh + H, :].reshape(R, Wp1) for dh in range(5)],
            axis=1).astype(bf16)
        o1 = jnp.dot(im1, w1_ref[...], preferred_element_type=f32)     # (R, W*Co)

        # ---- ReLU -> BN2 -> ConvTranspose 2x2 / s2 (block-diagonal matmul) ----
        y = bn(jnp.maximum(o1, 0.0), gd2_ref, g2_ref, b2_ref)
        u = jnp.dot(y, wup_ref[...], preferred_element_type=f32)       # (R, W*4*Co)
        u = jnp.where(u > 0, u, NEG_SLOPE * u)                         # LeakyReLU

        # ---- BN3 computed directly on the phase-blocked layout ----
        z = bn(u, gd3_ref, g3_ref, b3_ref)

        # ---- conv2 on the phase-blocked layout: 1-block halo, 3 slices ----
        zpad_ref[:, 0:1, :] = jnp.zeros((N, 1, Wp2), f32)
        zpad_ref[:, H + 1:H + 2, :] = jnp.zeros((N, 1, Wp2), f32)
        zpad_ref[:, 1:H + 1, 0:C4] = jnp.zeros((N, H, C4), f32)
        zpad_ref[:, 1:H + 1, (W + 1) * C4:(W + 2) * C4] = jnp.zeros((N, H, C4), f32)
        zpad_ref[:, 1:H + 1, C4:(W + 1) * C4] = z.reshape(N, H, C3)

        im2 = jnp.concatenate(
            [zpad_ref[:, rb:rb + H, :].reshape(R, Wp2) for rb in range(3)],
            axis=1).astype(bf16)
        o2 = jnp.dot(im2, w2_ref[...], preferred_element_type=f32)     # (R, W*4*Co)

        # final LeakyReLU; output stays lane-dense (R, W*4*Co) = (32, 256)
        out_ref[...] = jnp.where(o2 > 0, o2, NEG_SLOPE * o2)

    vmem = pl.BlockSpec(memory_space=pltpu.MemorySpace.VMEM)
    call = pl.pallas_call(
        kernel,
        out_shape=jax.ShapeDtypeStruct((R, C3), jnp.float32),
        in_specs=[vmem] * 13,
        out_specs=vmem,
        scratch_shapes=[
            pltpu.VMEM((N, H + 4, Wp1), jnp.float32),   # zero-padded BN1 output
            pltpu.VMEM((N, H + 2, Wp2), jnp.float32),   # zero-padded phase-blocked BN3 output
        ],
    )
    # NOTE: at production sizes this single-shot design should be gridded over
    # N / H row-tiles (with a 2-row halo via the index_map) and pipelined with
    # BlockSpecs; at the test size everything (~1 MiB) stays resident in VMEM.

    @jax.jit
    def forward(x_nchw):
        # NCHW -> lane-folded channels-last (N, H, W*Ci): one input transpose.
        xf = jnp.transpose(x_nchw, (0, 2, 3, 1)).reshape(N, H, C1)
        of = call(xf, kp['w1'], kp['wup'], kp['w2'],
                  kp['gd1'], kp['gd2'], kp['gd3'],
                  kp['g1'], kp['b1'], kp['g2'], kp['b2'], kp['g3'], kp['b3'])
        # (N*H, W*2*2*Co) -> NCHW (N, Co, 2H, 2W): the stride-2 phase un-blocking
        # and the NHWC->NCHW conversion collapse into this single transpose.
        o6 = of.reshape(N, H, W, 2, 2, Co)
        return jnp.transpose(o6, (0, 5, 1, 3, 2, 4)).reshape(N, Co, 2 * H, 2 * W)

    return forward


# ----------------------------------------------------------------------------
# Deterministic parameter init (matches the PyTorch module's parameter shapes)
# ----------------------------------------------------------------------------
def init_params(key, chan_in, chan_out):
    ks = jax.random.split(key, 9)
    w1 = 0.1 * jax.random.normal(ks[0], (5, 5, chan_in, chan_out), jnp.float32)    # conv  (HWIO)
    wup = 0.1 * jax.random.normal(ks[1], (chan_out, chan_out, 2, 2), jnp.float32)  # ConvTranspose2d (Cin,Cout,kh,kw)
    w2 = 0.1 * jax.random.normal(ks[2], (5, 5, chan_out, chan_out), jnp.float32)   # conv2 (HWIO)
    g1 = 1.0 + 0.1 * jax.random.normal(ks[3], (1, chan_in), jnp.float32)
    b1 = 0.1 * jax.random.normal(ks[4], (1, chan_in), jnp.float32)
    g2 = 1.0 + 0.1 * jax.random.normal(ks[5], (1, chan_out), jnp.float32)
    b2 = 0.1 * jax.random.normal(ks[6], (1, chan_out), jnp.float32)
    g3 = 1.0 + 0.1 * jax.random.normal(ks[7], (1, chan_out), jnp.float32)
    b3 = 0.1 * jax.random.normal(ks[8], (1, chan_out), jnp.float32)
    return (w1, wup, w2, g1, b1, g2, b2, g3, b3)


# ----------------------------------------------------------------------------
# Pure-JAX reference (mirrors the PyTorch forward in NCHW)
# ----------------------------------------------------------------------------
def decoder_reference(x_nchw, params):
    w1, wup, w2, g1, b1, g2, b2, g3, b3 = params

    def bn(x, g, b):
        m = jnp.mean(x, axis=(0, 2, 3), keepdims=True)
        v = jnp.mean((x - m) ** 2, axis=(0, 2, 3), keepdims=True)
        return (x - m) / jnp.sqrt(v + EPS) * g.reshape(1, -1, 1, 1) + b.reshape(1, -1, 1, 1)

    def conv5(x, w_hwio):
        w_oihw = jnp.transpose(w_hwio, (3, 2, 0, 1))
        return lax.conv_general_dilated(x, w_oihw, (1, 1), ((2, 2), (2, 2)),
                                        dimension_numbers=('NCHW', 'OIHW', 'NCHW'),
                                        precision=lax.Precision.HIGHEST)

    out = bn(x_nchw, g1, b1)
    out = conv5(out, w1)
    out = jnp.maximum(out, 0.0)
    out = bn(out, g2, b2)
    N, C, H, W = out.shape
    t = jnp.einsum('nchw,cdij->ndhiwj', out, wup,
                   precision=lax.Precision.HIGHEST)            # ConvTranspose 2x2 / stride 2
    out = t.reshape(N, C, 2 * H, 2 * W)
    out = jnp.where(out > 0, out, NEG_SLOPE * out)
    out = bn(out, g3, b3)
    out = conv5(out, w2)
    out = jnp.where(out > 0, out, NEG_SLOPE * out)
    return out


if __name__ == "__main__":
    key = jax.random.PRNGKey(0)
    N, chan_in, chan_out, H, W = 2, 8, 4, 16, 16

    kx, kparam = jax.random.split(key)
    x = jax.random.normal(kx, (N, chan_in, H, W), jnp.float32)   # NCHW like PyTorch
    params = init_params(kparam, chan_in, chan_out)

    forward = make_decoder_forward(params, N, H, W)
    out = jax.block_until_ready(forward(x))

    assert out.shape == (N, chan_out, 2 * H, 2 * W), out.shape

    ref = decoder_reference(x, params)
    max_err = float(jnp.max(jnp.abs(out - ref)))
    if not bool(jnp.allclose(out, ref, rtol=2e-2, atol=2e-2)):
        raise AssertionError(f"Pallas output mismatch vs reference (max abs err={max_err})")

    print("KERNEL_OK")
</pallas_src>

<mosaic_0001>
module attributes {stable_mosaic.version = 11 : i64} {
  func.func @kernel(%arg0: memref<2x16x128xf32, #tpu.memory_space<vmem>>, %arg1: memref<800x64xbf16, #tpu.memory_space<vmem>>, %arg2: memref<64x256xf32, #tpu.memory_space<vmem>>, %arg3: memref<864x256xbf16, #tpu.memory_space<vmem>>, %arg4: memref<128x128xf32, #tpu.memory_space<vmem>>, %arg5: memref<64x64xf32, #tpu.memory_space<vmem>>, %arg6: memref<256x256xf32, #tpu.memory_space<vmem>>, %arg7: memref<1x128xf32, #tpu.memory_space<vmem>>, %arg8: memref<1x128xf32, #tpu.memory_space<vmem>>, %arg9: memref<1x64xf32, #tpu.memory_space<vmem>>, %arg10: memref<1x64xf32, #tpu.memory_space<vmem>>, %arg11: memref<1x256xf32, #tpu.memory_space<vmem>>, %arg12: memref<1x256xf32, #tpu.memory_space<vmem>>, %arg13: memref<32x256xf32, #tpu.memory_space<vmem>>, %arg14: memref<2x20x160xf32, #tpu.memory_space<vmem>>, %arg15: memref<2x18x288xf32, #tpu.memory_space<vmem>>) attributes {dimension_semantics = [], scalar_prefetch = 0 : i64, scratch_operands = 2 : i64, tpu.core_type = #tpu.core_type<tc>} {
    %c0 = arith.constant 0 : index
    %c0_0 = arith.constant 0 : index
    %c0_1 = arith.constant 0 : index
    %0 = vector.load %arg0[%c0, %c0_0, %c0_1] : memref<2x16x128xf32, #tpu.memory_space<vmem>>, vector<2x16x128xf32>
    %1 = vector.shape_cast %0 : vector<2x16x128xf32> to vector<32x128xf32>
    %cst = arith.constant dense<0.000000e+00> : vector<128xf32>
    %2 = vector.multi_reduction <add>, %1, %cst [0] : vector<32x128xf32> to vector<128xf32>
    %3 = vector.shape_cast %2 : vector<128xf32> to vector<1x128xf32>
    %c0_2 = arith.constant 0 : index
    %c0_3 = arith.constant 0 : index
    %4 = vector.load %arg4[%c0_2, %c0_3] : memref<128x128xf32, #tpu.memory_space<vmem>>, vector<128x128xf32>
    %cst_4 = arith.constant dense<0.000000e+00> : vector<1x128xf32>
    %5 = tpu.matmul %3, %4, %cst_4 {dimension_numbers = #tpu.dot_dimension_numbers<[1], [0], [0], [1], [0, 0, 1, 1], [], []>} : vector<1x128xf32>, vector<128x128xf32>, vector<1x128xf32> -> vector<1x128xf32>
    %6 = vector.broadcast %5 : vector<1x128xf32> to vector<32x128xf32>
    %7 = arith.subf %1, %6 : vector<32x128xf32>
    %8 = arith.mulf %7, %7 : vector<32x128xf32>
    %cst_5 = arith.constant dense<0.000000e+00> : vector<128xf32>
    %9 = vector.multi_reduction <add>, %8, %cst_5 [0] : vector<32x128xf32> to vector<128xf32>
    %10 = vector.shape_cast %9 : vector<128xf32> to vector<1x128xf32>
    %c0_6 = arith.constant 0 : index
    %c0_7 = arith.constant 0 : index
    %11 = vector.load %arg4[%c0_6, %c0_7] : memref<128x128xf32, #tpu.memory_space<vmem>>, vector<128x128xf32>
    %cst_8 = arith.constant dense<0.000000e+00> : vector<1x128xf32>
    %12 = tpu.matmul %10, %11, %cst_8 {dimension_numbers = #tpu.dot_dimension_numbers<[1], [0], [0], [1], [0, 0, 1, 1], [], []>} : vector<1x128xf32>, vector<128x128xf32>, vector<1x128xf32> -> vector<1x128xf32>
    %cst_9 = arith.constant 9.99999974E-6 : f32
    %13 = vector.broadcast %cst_9 : f32 to vector<1x128xf32>
    %14 = arith.addf %12, %13 : vector<1x128xf32>
    %15 = math.rsqrt %14 : vector<1x128xf32>
    %16 = vector.broadcast %15 : vector<1x128xf32> to vector<32x128xf32>
    %17 = arith.mulf %7, %16 : vector<32x128xf32>
    %c0_10 = arith.constant 0 : index
    %c0_11 = arith.constant 0 : index
    %18 = vector.load %arg7[%c0_10, %c0_11] : memref<1x128xf32, #tpu.memory_space<vmem>>, vector<1x128xf32>
    %19 = vector.broadcast %18 : vector<1x128xf32> to vector<32x128xf32>
    %20 = arith.mulf %17, %19 : vector<32x128xf32>
    %c0_12 = arith.constant 0 : index
    %c0_13 = arith.constant 0 : index
    %21 = vector.load %arg8[%c0_12, %c0_13] : memref<1x128xf32, #tpu.memory_space<vmem>>, vector<1x128xf32>
    %22 = vector.broadcast %21 : vector<1x128xf32> to vector<32x128xf32>
    %23 = arith.addf %20, %22 : vector<32x128xf32>
    %cst_14 = arith.constant 0.000000e+00 : f32
    %24 = vector.broadcast %cst_14 : f32 to vector<2x2x160xf32>
    %c0_15 = arith.constant 0 : index
    %c0_16 = arith.constant 0 : index
    %c0_17 = arith.constant 0 : index
    %25 = vector.load %arg14[%c0_15, %c0_16, %c0_17] : memref<2x20x160xf32, #tpu.memory_space<vmem>>, vector<2x2x160xf32>
    tpu.vector_store %arg14[%c0_15, %c0_16, %c0_17], %24 {strides = array<i32>} : memref<2x20x160xf32, #tpu.memory_space<vmem>>, vector<2x2x160xf32>,
    %cst_18 = arith.constant 0.000000e+00 : f32
    %26 = vector.broadcast %cst_18 : f32 to vector<2x2x160xf32>
    %c0_19 = arith.constant 0 : index
    %c18 = arith.constant 18 : index
    %c0_20 = arith.constant 0 : index
    %27 = vector.load %arg14[%c0_19, %c18, %c0_20] : memref<2x20x160xf32, #tpu.memory_space<vmem>>, vector<2x2x160xf32>
    tpu.vector_store %arg14[%c0_19, %c18, %c0_20], %26 {strides = array<i32>} : memref<2x20x160xf32, #tpu.memory_space<vmem>>, vector<2x2x160xf32>,
    %cst_21 = arith.constant 0.000000e+00 : f32
    %28 = vector.broadcast %cst_21 : f32 to vector<2x16x16xf32>
    %c0_22 = arith.constant 0 : index
    %c2 = arith.constant 2 : index
    %c0_23 = arith.constant 0 : index
    %29 = vector.load %arg14[%c0_22, %c2, %c0_23] : memref<2x20x160xf32, #tpu.memory_space<vmem>>, vector<2x16x16xf32>
    tpu.vector_store %arg14[%c0_22, %c2, %c0_23], %28 {strides = array<i32>} : memref<2x20x160xf32, #tpu.memory_space<vmem>>, vector<2x16x16xf32>,
    %cst_24 = arith.constant 0.000000e+00 : f32
    %30 = vector.broadcast %cst_24 : f32 to vector<2x16x16xf32>
    %c0_25 = arith.constant 0 : index
    %c2_26 = arith.constant 2 : index
    %c144 = arith.constant 144 : index
    %31 = vector.load %arg14[%c0_25, %c2_26, %c144] : memref<2x20x160xf32, #tpu.memory_space<vmem>>, vector<2x16x16xf32>
    tpu.vector_store %arg14[%c0_25, %c2_26, %c144], %30 {strides = array<i32>} : memref<2x20x160xf32, #tpu.memory_space<vmem>>, vector<2x16x16xf32>,
    %32 = vector.shape_cast %23 : vector<32x128xf32> to vector<2x16x128xf32>
    %c0_27 = arith.constant 0 : index
    %c2_28 = arith.constant 2 : index
    %c16 = arith.constant 16 : index
    %33 = vector.load %arg14[%c0_27, %c2_28, %c16] : memref<2x20x160xf32, #tpu.memory_space<vmem>>, vector<2x16x128xf32>
    tpu.vector_store %arg14[%c0_27, %c2_28, %c16], %32 {strides = array<i32>} : memref<2x20x160xf32, #tpu.memory_space<vmem>>, vector<2x16x128xf32>,
    %c0_29 = arith.constant 0 : index
    %c0_30 = arith.constant 0 : index
    %c0_31 = arith.constant 0 : index
    %34 = vector.load %arg14[%c0_29, %c0_30, %c0_31] : memref<2x20x160xf32, #tpu.memory_space<vmem>>, vector<2x16x160xf32>
    %35 = vector.shape_cast %34 : vector<2x16x160xf32> to vector<32x160xf32>
    %c0_32 = arith.constant 0 : index
    %c1 = arith.constant 1 : index
    %c0_33 = arith.constant 0 : index
    %36 = vector.load %arg14[%c0_32, %c1, %c0_33] : memref<2x20x160xf32, #tpu.memory_space<vmem>>, vector<2x16x160xf32>
    %37 = vector.shape_cast %36 : vector<2x16x160xf32> to vector<32x160xf32>
    %c0_34 = arith.constant 0 : index
    %c2_35 = arith.constant 2 : index
    %c0_36 = arith.constant 0 : index
    %38 = vector.load %arg14[%c0_34, %c2_35, %c0_36] : memref<2x20x160xf32, #tpu.memory_space<vmem>>, vector<2x16x160xf32>
    %39 = vector.shape_cast %38 : vector<2x16x160xf32> to vector<32x160xf32>
    %c0_37 = arith.constant 0 : index
    %c3 = arith.constant 3 : index
    %c0_38 = arith.constant 0 : index
    %40 = vector.load %arg14[%c0_37, %c3, %c0_38] : memref<2x20x160xf32, #tpu.memory_space<vmem>>, vector<2x16x160xf32>
    %41 = vector.shape_cast %40 : vector<2x16x160xf32> to vector<32x160xf32>
    %c0_39 = arith.constant 0 : index
    %c4 = arith.constant 4 : index
    %c0_40 = arith.constant 0 : index
    %42 = vector.load %arg14[%c0_39, %c4, %c0_40] : memref<2x20x160xf32, #tpu.memory_space<vmem>>, vector<2x16x160xf32>
    %43 = vector.shape_cast %42 : vector<2x16x160xf32> to vector<32x160xf32>
    %44 = tpu.concatenate %35, %37, %39, %41, %43 in 1 : vector<32x160xf32>, vector<32x160xf32>, vector<32x160xf32>, vector<32x160xf32>, vector<32x160xf32> -> vector<32x800xf32>
    %45 = arith.truncf %44 : vector<32x800xf32> to vector<32x800xbf16>
    %c0_41 = arith.constant 0 : index
    %c0_42 = arith.constant 0 : index
    %46 = vector.load %arg1[%c0_41, %c0_42] : memref<800x64xbf16, #tpu.memory_space<vmem>>, vector<800x64xbf16>
    %cst_43 = arith.constant dense<0.000000e+00> : vector<32x64xf32>
    %47 = tpu.matmul %45, %46, %cst_43 {dimension_numbers = #tpu.dot_dimension_numbers<[1], [0], [0], [1], [0, 0, 1, 1], [], []>} : vector<32x800xbf16>, vector<800x64xbf16>, vector<32x64xf32> -> vector<32x64xf32>
    %cst_44 = arith.constant 0.000000e+00 : f32
    %48 = vector.broadcast %cst_44 : f32 to vector<32x64xf32>
    %49 = arith.maximumf %47, %48 : vector<32x64xf32>
    %cst_45 = arith.constant dense<0.000000e+00> : vector<64xf32>
    %50 = vector.multi_reduction <add>, %49, %cst_45 [0] : vector<32x64xf32> to vector<64xf32>
    %51 = vector.shape_cast %50 : vector<64xf32> to vector<1x64xf32>
    %c0_46 = arith.constant 0 : index
    %c0_47 = arith.constant 0 : index
    %52 = vector.load %arg5[%c0_46, %c0_47] : memref<64x64xf32, #tpu.memory_space<vmem>>, vector<64x64xf32>
    %cst_48 = arith.constant dense<0.000000e+00> : vector<1x64xf32>
    %53 = tpu.matmul %51, %52, %cst_48 {dimension_numbers = #tpu.dot_dimension_numbers<[1], [0], [0], [1], [0, 0, 1, 1], [], []>} : vector<1x64xf32>, vector<64x64xf32>, vector<1x64xf32> -> vector<1x64xf32>
    %54 = vector.broadcast %53 : vector<1x64xf32> to vector<32x64xf32>
    %55 = arith.subf %49, %54 : vector<32x64xf32>
    %56 = arith.mulf %55, %55 : vector<32x64xf32>
    %cst_49 = arith.constant dense<0.000000e+00> : vector<64xf32>
    %57 = vector.multi_reduction <add>, %56, %cst_49 [0] : vector<32x64xf32> to vector<64xf32>
    %58 = vector.shape_cast %57 : vector<64xf32> to vector<1x64xf32>
    %c0_50 = arith.constant 0 : index
    %c0_51 = arith.constant 0 : index
    %59 = vector.load %arg5[%c0_50, %c0_51] : memref<64x64xf32, #tpu.memory_space<vmem>>, vector<64x64xf32>
    %cst_52 = arith.constant dense<0.000000e+00> : vector<1x64xf32>
    %60 = tpu.matmul %58, %59, %cst_52 {dimension_numbers = #tpu.dot_dimension_numbers<[1], [0], [0], [1], [0, 0, 1, 1], [], []>} : vector<1x64xf32>, vector<64x64xf32>, vector<1x64xf32> -> vector<1x64xf32>
    %cst_53 = arith.constant 9.99999974E-6 : f32
    %61 = vector.broadcast %cst_53 : f32 to vector<1x64xf32>
    %62 = arith.addf %60, %61 : vector<1x64xf32>
    %63 = math.rsqrt %62 : vector<1x64xf32>
    %64 = vector.broadcast %63 : vector<1x64xf32> to vector<32x64xf32>
    %65 = arith.mulf %55, %64 : vector<32x64xf32>
    %c0_54 = arith.constant 0 : index
    %c0_55 = arith.constant 0 : index
    %66 = vector.load %arg9[%c0_54, %c0_55] : memref<1x64xf32, #tpu.memory_space<vmem>>, vector<1x64xf32>
    %67 = vector.broadcast %66 : vector<1x64xf32> to vector<32x64xf32>
    %68 = arith.mulf %65, %67 : vector<32x64xf32>
    %c0_56 = arith.constant 0 : index
    %c0_57 = arith.constant 0 : index
    %69 = vector.load %arg10[%c0_56, %c0_57] : memref<1x64xf32, #tpu.memory_space<vmem>>, vector<1x64xf32>
    %70 = vector.broadcast %69 : vector<1x64xf32> to vector<32x64xf32>
    %71 = arith.addf %68, %70 : vector<32x64xf32>
    %c0_58 = arith.constant 0 : index
    %c0_59 = arith.constant 0 : index
    %72 = vector.load %arg2[%c0_58, %c0_59] : memref<64x256xf32, #tpu.memory_space<vmem>>, vector<64x256xf32>
    %cst_60 = arith.constant dense<0.000000e+00> : vector<32x256xf32>
    %73 = tpu.matmul %71, %72, %cst_60 {dimension_numbers = #tpu.dot_dimension_numbers<[1], [0], [0], [1], [0, 0, 1, 1], [], []>} : vector<32x64xf32>, vector<64x256xf32>, vector<32x256xf32> -> vector<32x256xf32>
    %cst_61 = arith.constant 0.000000e+00 : f32
    %74 = vector.broadcast %cst_61 : f32 to vector<32x256xf32>
    %75 = arith.cmpf ogt, %73, %74 : vector<32x256xf32>
    %cst_62 = arith.constant 2.000000e-01 : f32
    %76 = vector.broadcast %cst_62 : f32 to vector<32x256xf32>
    %77 = arith.mulf %76, %73 : vector<32x256xf32>
    %78 = arith.select %75, %73, %77 : vector<32x256xi1>, vector<32x256xf32>
    %cst_63 = arith.constant dense<0.000000e+00> : vector<256xf32>
    %79 = vector.multi_reduction <add>, %78, %cst_63 [0] : vector<32x256xf32> to vector<256xf32>
    %80 = vector.shape_cast %79 : vector<256xf32> to vector<1x256xf32>
    %c0_64 = arith.constant 0 : index
    %c0_65 = arith.constant 0 : index
    %81 = vector.load %arg6[%c0_64, %c0_65] : memref<256x256xf32, #tpu.memory_space<vmem>>, vector<256x256xf32>
    %cst_66 = arith.constant dense<0.000000e+00> : vector<1x256xf32>
    %82 = tpu.matmul %80, %81, %cst_66 {dimension_numbers = #tpu.dot_dimension_numbers<[1], [0], [0], [1], [0, 0, 1, 1], [], []>} : vector<1x256xf32>, vector<256x256xf32>, vector<1x256xf32> -> vector<1x256xf32>
    %83 = vector.broadcast %82 : vector<1x256xf32> to vector<32x256xf32>
    %84 = arith.subf %78, %83 : vector<32x256xf32>
    %85 = arith.mulf %84, %84 : vector<32x256xf32>
    %cst_67 = arith.constant dense<0.000000e+00> : vector<256xf32>
    %86 = vector.multi_reduction <add>, %85, %cst_67 [0] : vector<32x256xf32> to vector<256xf32>
    %87 = vector.shape_cast %86 : vector<256xf32> to vector<1x256xf32>
    %c0_68 = arith.constant 0 : index
    %c0_69 = arith.constant 0 : index
    %88 = vector.load %arg6[%c0_68, %c0_69] : memref<256x256xf32, #tpu.memory_space<vmem>>, vector<256x256xf32>
    %cst_70 = arith.constant dense<0.000000e+00> : vector<1x256xf32>
    %89 = tpu.matmul %87, %88, %cst_70 {dimension_numbers = #tpu.dot_dimension_numbers<[1], [0], [0], [1], [0, 0, 1, 1], [], []>} : vector<1x256xf32>, vector<256x256xf32>, vector<1x256xf32> -> vector<1x256xf32>
    %cst_71 = arith.constant 9.99999974E-6 : f32
    %90 = vector.broadcast %cst_71 : f32 to vector<1x256xf32>
    %91 = arith.addf %89, %90 : vector<1x256xf32>
    %92 = math.rsqrt %91 : vector<1x256xf32>
    %93 = vector.broadcast %92 : vector<1x256xf32> to vector<32x256xf32>
    %94 = arith.mulf %84, %93 : vector<32x256xf32>
    %c0_72 = arith.constant 0 : index
    %c0_73 = arith.constant 0 : index
    %95 = vector.load %arg11[%c0_72, %c0_73] : memref<1x256xf32, #tpu.memory_space<vmem>>, vector<1x256xf32>
    %96 = vector.broadcast %95 : vector<1x256xf32> to vector<32x256xf32>
    %97 = arith.mulf %94, %96 : vector<32x256xf32>
    %c0_74 = arith.constant 0 : index
    %c0_75 = arith.constant 0 : index
    %98 = vector.load %arg12[%c0_74, %c0_75] : memref<1x256xf32, #tpu.memory_space<vmem>>, vector<1x256xf32>
    %99 = vector.broadcast %98 : vector<1x256xf32> to vector<32x256xf32>
    %100 = arith.addf %97, %99 : vector<32x256xf32>
    %cst_76 = arith.constant 0.000000e+00 : f32
    %101 = vector.broadcast %cst_76 : f32 to vector<2x1x288xf32>
    %c0_77 = arith.constant 0 : index
    %c0_78 = arith.constant 0 : index
    %c0_79 = arith.constant 0 : index
    %102 = vector.load %arg15[%c0_77, %c0_78, %c0_79] : memref<2x18x288xf32, #tpu.memory_space<vmem>>, vector<2x1x288xf32>
    tpu.vector_store %arg15[%c0_77, %c0_78, %c0_79], %101 {strides = array<i32>} : memref<2x18x288xf32, #tpu.memory_space<vmem>>, vector<2x1x288xf32>,
    %cst_80 = arith.constant 0.000000e+00 : f32
    %103 = vector.broadcast %cst_80 : f32 to vector<2x1x288xf32>
    %c0_81 = arith.constant 0 : index
    %c17 = arith.constant 17 : index
    %c0_82 = arith.constant 0 : index
    %104 = vector.load %arg15[%c0_81, %c17, %c0_82] : memref<2x18x288xf32, #tpu.memory_space<vmem>>, vector<2x1x288xf32>
    tpu.vector_store %arg15[%c0_81, %c17, %c0_82], %103 {strides = array<i32>} : memref<2x18x288xf32, #tpu.memory_space<vmem>>, vector<2x1x288xf32>,
    %cst_83 = arith.constant 0.000000e+00 : f32
    %105 = vector.broadcast %cst_83 : f32 to vector<2x16x16xf32>
    %c0_84 = arith.constant 0 : index
    %c1_85 = arith.constant 1 : index
    %c0_86 = arith.constant 0 : index
    %106 = vector.load %arg15[%c0_84, %c1_85, %c0_86] : memref<2x18x288xf32, #tpu.memory_space<vmem>>, vector<2x16x16xf32>
    tpu.vector_store %arg15[%c0_84, %c1_85, %c0_86], %105 {strides = array<i32>} : memref<2x18x288xf32, #tpu.memory_space<vmem>>, vector<2x16x16xf32>,
    %cst_87 = arith.constant 0.000000e+00 : f32
    %107 = vector.broadcast %cst_87 : f32 to vector<2x16x16xf32>
    %c0_88 = arith.constant 0 : index
    %c1_89 = arith.constant 1 : index
    %c272 = arith.constant 272 : index
    %108 = vector.load %arg15[%c0_88, %c1_89, %c272] : memref<2x18x288xf32, #tpu.memory_space<vmem>>, vector<2x16x16xf32>
    tpu.vector_store %arg15[%c0_88, %c1_89, %c272], %107 {strides = array<i32>} : memref<2x18x288xf32, #tpu.memory_space<vmem>>, vector<2x16x16xf32>,
    %109 = vector.shape_cast %100 : vector<32x256xf32> to vector<2x16x256xf32>
    %c0_90 = arith.constant 0 : index
    %c1_91 = arith.constant 1 : index
    %c16_92 = arith.constant 16 : index
    %110 = vector.load %arg15[%c0_90, %c1_91, %c16_92] : memref<2x18x288xf32, #tpu.memory_space<vmem>>, vector<2x16x256xf32>
    tpu.vector_store %arg15[%c0_90, %c1_91, %c16_92], %109 {strides = array<i32>} : memref<2x18x288xf32, #tpu.memory_space<vmem>>, vector<2x16x256xf32>,
    %c0_93 = arith.constant 0 : index
    %c0_94 = arith.constant 0 : index
    %c0_95 = arith.constant 0 : index
    %111 = vector.load %arg15[%c0_93, %c0_94, %c0_95] : memref<2x18x288xf32, #tpu.memory_space<vmem>>, vector<2x16x288xf32>
    %112 = vector.shape_cast %111 : vector<2x16x288xf32> to vector<32x288xf32>
    %c0_96 = arith.constant 0 : index
    %c1_97 = arith.constant 1 : index
    %c0_98 = arith.constant 0 : index
    %113 = vector.load %arg15[%c0_96, %c1_97, %c0_98] : memref<2x18x288xf32, #tpu.memory_space<vmem>>, vector<2x16x288xf32>
    %114 = vector.shape_cast %113 : vector<2x16x288xf32> to vector<32x288xf32>
    %c0_99 = arith.constant 0 : index
    %c2_100 = arith.constant 2 : index
    %c0_101 = arith.constant 0 : index
    %115 = vector.load %arg15[%c0_99, %c2_100, %c0_101] : memref<2x18x288xf32, #tpu.memory_space<vmem>>, vector<2x16x288xf32>
    %116 = vector.shape_cast %115 : vector<2x16x288xf32> to vector<32x288xf32>
    %117 = tpu.concatenate %112, %114, %116 in 1 : vector<32x288xf32>, vector<32x288xf32>, vector<32x288xf32> -> vector<32x864xf32>
    %118 = arith.truncf %117 : vector<32x864xf32> to vector<32x864xbf16>
    %c0_102 = arith.constant 0 : index
    %c0_103 = arith.constant 0 : index
    %119 = vector.load %arg3[%c0_102, %c0_103] : memref<864x256xbf16, #tpu.memory_space<vmem>>, vector<864x256xbf16>
    %cst_104 = arith.constant dense<0.000000e+00> : vector<32x256xf32>
    %120 = tpu.matmul %118, %119, %cst_104 {dimension_numbers = #tpu.dot_dimension_numbers<[1], [0], [0], [1], [0, 0, 1, 1], [], []>} : vector<32x864xbf16>, vector<864x256xbf16>, vector<32x256xf32> -> vector<32x256xf32>
    %cst_105 = arith.constant 0.000000e+00 : f32
    %121 = vector.broadcast %cst_105 : f32 to vector<32x256xf32>
    %122 = arith.cmpf ogt, %120, %121 : vector<32x256xf32>
    %cst_106 = arith.constant 2.000000e-01 : f32
    %123 = vector.broadcast %cst_106 : f32 to vector<32x256xf32>
    %124 = arith.mulf %123, %120 : vector<32x256xf32>
    %125 = arith.select %122, %120, %124 : vector<32x256xi1>, vector<32x256xf32>
    %c0_107 = arith.constant 0 : index
    %c0_108 = arith.constant 0 : index
    %126 = vector.load %arg13[%c0_107, %c0_108] : memref<32x256xf32, #tpu.memory_space<vmem>>, vector<32x256xf32>
    tpu.vector_store %arg13[%c0_107, %c0_108], %125 {strides = array<i32>} : memref<32x256xf32, #tpu.memory_space<vmem>>, vector<32x256xf32>,
    return
  }
}

</mosaic_0001>

<bundles_post_ra>
// kernel: forward.1
= control target key start
LH: loop header
LB: loop body
LE: loop exit
PB: predicated region body
PF: predicated region fallthrough
CT: control target
= control target key end

     0   :  { %v4187_v0 = vmov 0.0|0.0   ;;  %vm4188_vm0 = vmmov 0   ;;  %v4189_v4 = vmov 0.0   ;;  %v144_v39 = vlaneseq  ;;  %s4192_s30 = smov 32   ;;  %s4193_s22 = smov 96   ;;  %s5775_s4 = inlined_call_operand.vmem [shape: f32[128,128], index: 4, kind: input, shape index: {}]   ;;  %s5776_s0 = inlined_call_operand.vmem [shape: f32[2,16,128], index: 0, kind: input, shape index: {}]   ;;  %s5777_s7 = inlined_call_operand.vmem [shape: f32[1,128], index: 7, kind: input, shape index: {}]   ;;  %s5778_s8 = inlined_call_operand.vmem [shape: f32[1,128], index: 8, kind: input, shape index: {}]   ;;  %s5779_s1 = inlined_call_operand.vmem [shape: bf16[800,64], index: 1, kind: input, shape index: {}]   ;;  %s5780_s5 = inlined_call_operand.vmem [shape: f32[64,64], index: 5, kind: input, shape index: {}]   ;;  %s5781_s2 = inlined_call_operand.vmem [shape: f32[64,256], index: 2, kind: input, shape index: {}]   ;;  %s5782_s6 = inlined_call_operand.vmem [shape: f32[256,256], index: 6, kind: input, shape index: {}]   ;;  %s5783_s9 = inlined_call_operand.vmem [shape: f32[1,64], index: 9, kind: input, shape index: {}]   ;;  %s5784_s10 = inlined_call_operand.vmem [shape: f32[1,64], index: 10, kind: input, shape index: {}]   ;;  %s5785_s3 = inlined_call_operand.vmem [shape: bf16[864,256], index: 3, kind: input, shape index: {}]   ;;  %s5786_s11 = inlined_call_operand.vmem [shape: f32[1,256], index: 11, kind: input, shape index: {}]   ;;  %s5787_s12 = inlined_call_operand.vmem [shape: f32[1,256], index: 12, kind: input, shape index: {}]   ;;  %s5788_s13 = inlined_call_operand.vmem [shape: f32[32,256], index: 13, kind: output, shape index: {}]  }
   0x1   :  { %3599 = vmatprep.subr.bf16.mxu1 %v4187_v0  ;;  %v58_v1 = vld [vmem:[%s5775_s4] sm:$0xff]  ;;  %v59_v2 = vld [vmem:[%s5775_s4 + $0x8] sm:$0xff]  ;;  %v60_v3 = vld [vmem:[%s5775_s4 + $0x10] sm:$0xff]  ;;  %3515 = vmatprep.mubr.msk.f32.mxu1 %vm4188_vm0, %v4189_v4  ;;  %266 = vst [vmem:[#allocation2] sm:$0x3] %v4189_v4  ;;  %vm280_vm1 = vcmask 123904  }
   0x2   :  { %269 = vst [vmem:[#allocation2 + $0x30] sm:$0x3] %v4189_v4  ;;  %271 = vst [vmem:[#allocation2 + $0x20] sm:$0xc] %v4189_v4  ;;  %v3600_v5 = vpack.c.bf16 %v59_v2, %v58_v1  ;;  %v61_v6 = vld [vmem:[%s5775_s4 + $0x18] sm:$0xff]  ;;  %v62_v8 = vld [vmem:[%s5775_s4 + $0x20] sm:$0xff] }
   0x3   :  { %274 = vst [vmem:[#allocation2 + $0x50] sm:$0xc] %v4189_v4  ;;  %v3603_v7 = vpack.c.bf16 %v61_v6, %v60_v3  ;;  %v63_v9 = vld [vmem:[%s5775_s4 + $0x28] sm:$0xff]  ;;  %v4294_v10 = vld [vmem:[%s5776_s0] sm:$0xff]  ;;  %v4304_v12 = vld [vmem:[%s5776_s0 + $0x10] sm:$0xff]  ;;  %v4362_v40 = vshrl.u32 %v144_v39, 7 }
   0x4   :  { %3601 = vmatpush3.bf16.msra.mxu1 %v3600_v5  ;;  %v4299_v11 = vld [vmem:[%s5776_s0 + $0x8] sm:$0xff]  ;;  %v3606_v14 = vpack.c.bf16 %v63_v9, %v62_v8  ;;  %v4311_v15 = vld [vmem:[%s5776_s0 + $0x18] sm:$0xff]  ;;  %v64_v16 = vld [vmem:[%s5775_s4 + $0x30] sm:$0xff]  ;;  %vm289_vm2 = vcmask 255104   ;;  %281 = vst.msk [vmem:[#allocation2 + $0x20] sm:$0x3] %vm280_vm1, %v4189_v4 }
   0x5   :  { %3602 = vmatprep.subr.bf16.mxu1 %v4187_v0  ;;  %v49_v13 = vadd.f32 %v4299_v11, %v4294_v10  ;;  %v65_v17 = vld [vmem:[%s5775_s4 + $0x38] sm:$0xff]  ;;  %v66_v21 = vld [vmem:[%s5775_s4 + $0x40] sm:$0xff]  ;;  %v67_v22 = vld [vmem:[%s5775_s4 + $0x48] sm:$0xff]  ;;  %v4365_v41 = vsub.s32 0, %v4362_v40  ;;  %290 = vst.msk [vmem:[#allocation2 + $0x28] sm:$0x3] %vm289_vm2, %v4189_v4 }
   0x6   :  { %v3609_v20 = vpack.c.bf16 %v65_v17, %v64_v16  ;;  %v3612_v25 = vpack.c.bf16 %v67_v22, %v66_v21  ;;  %v68_v26 = vld [vmem:[%s5775_s4 + $0x50] sm:$0xff]  ;;  %v69_v27 = vld [vmem:[%s5775_s4 + $0x58] sm:$0xff]  ;;  %v70_v30 = vld [vmem:[%s5775_s4 + $0x60] sm:$0xff]  ;;  %284 = vst.msk [vmem:[#allocation2 + $0x50] sm:$0x3] %vm280_vm1, %v4189_v4  ;;  %vm276_vm3 = vcmask 130050  }
   0x7   :  { %v50_v18 = vadd.f32 %v49_v13, %v4304_v12  ;;  %v3615_v29 = vpack.c.bf16 %v69_v27, %v68_v26  ;;  %v71_v31 = vld [vmem:[%s5775_s4 + $0x68] sm:$0xff]  ;;  %v72_v34 = vld [vmem:[%s5775_s4 + $0x70] sm:$0xff]  ;;  %v73_v35 = vld [vmem:[%s5775_s4 + $0x78] sm:$0xff]  ;;  %293 = vst.msk [vmem:[#allocation2 + $0x58] sm:$0x3] %vm289_vm2, %v4189_v4  ;;  %vm285_vm4 = vcmask 261250  }
   0x8   :  { %3604 = vmatpush3.bf16.msra.mxu1 %v3603_v7  ;;  %v3618_v33 = vpack.c.bf16 %v71_v31, %v70_v30  ;;  %v3621_v37 = vpack.c.bf16 %v73_v35, %v72_v34  ;;  %277 = vst.msk [vmem:[#allocation2] sm:$0xfc] %vm276_vm3, %v4189_v4  ;;  %282 = vst.msk [vmem:[#allocation2 + $0x30] sm:$0xfc] %vm276_vm3, %v4189_v4  ;;  %vm267_vm5 = vcmask 254976   ;;  %vm278_vm6 = vcmask 130048  }
   0x9   :  { %3605 = vmatprep.subr.bf16.mxu1 %v4187_v0  ;;  %v51_v19 = vadd.f32 %v50_v18, %v4311_v15  ;;  %286 = vst.msk [vmem:[#allocation2 + $0x8] sm:$0xfc] %vm285_vm4, %v4189_v4  ;;  %291 = vst.msk [vmem:[#allocation2 + $0x38] sm:$0xfc] %vm285_vm4, %v4189_v4  ;;  %vm287_vm7 = vcmask 261248   ;;  %vm272_vm8 = vcmask 257026  }
   0xa   :  { %268 = vst.msk [vmem:[#allocation2 + $0x8] sm:$0x3] %vm267_vm5, %v4189_v4  ;;  %270 = vst.msk [vmem:[#allocation2 + $0x38] sm:$0x3] %vm267_vm5, %v4189_v4  ;;  %vm298_vm9 = vcmask 1041408   ;;  %v3968_v26 = vld [vmem:[%s5779_s1] sm:$0xff]  }
   0xb   :  { %v52_v23 = vrot.slane %v51_v19, 4  ;;  %279 = vst.msk [vmem:[#allocation2 + $0x10] sm:$0xff] %vm278_vm6, %v4189_v4  ;;  %283 = vst.msk [vmem:[#allocation2 + $0x40] sm:$0xff] %vm278_vm6, %v4189_v4  ;;  %v3969_v27 = vld [vmem:[%s5779_s1 + $0x48] sm:$0xff]   ;;  %v3972_v30 = vld [vmem:[%s5779_s1 + $0x10] sm:$0xff]   ;;  %vm329_vm10 = vcmask 1041536  }
   0xc   :  { %3607 = vmatpush3.bf16.msra.mxu1 %v3606_v14  ;;  %288 = vst.msk [vmem:[#allocation2 + $0x18] sm:$0xff] %vm287_vm7, %v4189_v4  ;;  %292 = vst.msk [vmem:[#allocation2 + $0x48] sm:$0xff] %vm287_vm7, %v4189_v4  ;;  %v3973_v31 = vld [vmem:[%s5779_s1 + $0xc0] sm:$0xff]   ;;  %v3976_v34 = vld [vmem:[%s5779_s1 + $0x18] sm:$0xff]   ;;  %vm323_vm11 = vcmask 1047682   ;;  %vm326_vm12 = vcmask 1047680  }
   0xd   :  { %3608 = vmatprep.subr.bf16.mxu1 %v4187_v0  ;;  %v53_v24 = vadd.f32 %v52_v23, %v51_v19  ;;  %1930 = vst.msk [vmem:[#allocation3 + $0x18] sm:$0xff] %vm278_vm6, %v4189_v4  ;;  %1934 = vst.msk [vmem:[#allocation3 + $0x60] sm:$0xff] %vm278_vm6, %v4189_v4  ;;  %v3977_v35 = vld [vmem:[%s5779_s1 + $0xc8] sm:$0xff]   ;;  %vm403_vm13 = vcmask 1045504   ;;  %vm366_vm14 = vcmask 1046528   ;;  %vm440_vm15 = vcmask 1044480  }
   0xe   :  { %1938 = vst.msk [vmem:[#allocation3 + $0x28] sm:$0xff] %vm287_vm7, %v4189_v4  ;;  %1942 = vst.msk [vmem:[#allocation3 + $0x70] sm:$0xff] %vm287_vm7, %v4189_v4  ;;  %s4191_s4 = smov 64   ;;  %vm551_vm2 = vcmask 523264   ;;  %vm580_vm4 = vcmask 785408  }
   0xf   :  { %v54_v28 = vrot.slane %v53_v24, 2  ;;  %275 = vst.msk [vmem:[#allocation2 + $0x58] sm:$0xc] %vm272_vm8, %v4189_v4  ;;  %273 = vst.msk [vmem:[#allocation2 + $0x28] sm:$0xc] %vm272_vm8, %v4189_v4 }
  0x10   :  { %3610 = vmatpush3.bf16.msra.mxu1 %v3609_v20 }
  0x11   :  { %3611 = vmatprep.subr.bf16.mxu1 %v4187_v0  ;;  %v55_v32 = vadd.f32 %v54_v28, %v53_v24  ;;  %v3970_v28 = vld [vmem:[%s5779_s1 + $0x8] sm:$0xff]  }
  0x13   :  { %v56_v36 = vrot.slane %v55_v32, 1 }
  0x14   :  { %3613 = vmatpush3.bf16.msra.mxu1 %v3612_v25 }
  0x15   :  { %3614 = vmatprep.subr.bf16.mxu1 %v4187_v0  ;;  %v57_v38 = vadd.f32 %v56_v36, %v55_v32  ;;  %v3974_v32 = vld [vmem:[%s5779_s1 + $0x80] sm:$0xff]   ;;  %v3978_v36 = vld [vmem:[%s5779_s1 + $0x88] sm:$0xff]  }
  0x18   :  { %3616 = vmatpush3.bf16.msra.mxu1 %v3615_v29 }
  0x19   :  { %3617 = vmatprep.subr.bf16.mxu1 %v4187_v0 }
  0x1c   :  { %3619 = vmatpush3.bf16.msra.mxu1 %v3618_v33 }
  0x1d   :  { %3620 = vmatprep.subr.bf16.mxu1 %v4187_v0 }
  0x20   :  { %3622 = vmatpush3.bf16.msra.mxu1 %v3621_v37 }
  0x21   :  { %3623 = vmatprep.subr.bf16.mxu1 %v4187_v0 }
  0x23   :  { %3516 = vmatmul.mubr.f32.vlgmr.msra.gmra.mrb[0].mxu1 %v57_v38  ;;  %v3980_v38 = vld [vmem:[%s5779_s1 + $0x20] sm:$0xff]  }
  0x24   :  { %3625 = vmatpush3.bf16.msra.mxu1 %v3600_v5  ;;  %3550 = vmatprep.mubr.msk.f32.mxu1 %vm4188_vm0, %v4189_v4  ;;  %v3171_v5 = vld [vmem:[%s5777_s7] ss:$0 sm:$0xff]  ;;  %s4190_s7 = smov 16  }
  0x25   :  { %3626 = vmatprep.subr.bf16.mxu1 %v4187_v0 }
  0x28   :  { %3628 = vmatpush3.bf16.msra.mxu1 %v3603_v7 }
  0x29   :  { %3629 = vmatprep.subr.bf16.mxu1 %v4187_v0 }
  0x2c   :  { %3631 = vmatpush3.bf16.msra.mxu1 %v3606_v14 }
  0x2d   :  { %3632 = vmatprep.subr.bf16.mxu1 %v4187_v0 }
  0x30   :  { %3634 = vmatpush3.bf16.msra.mxu1 %v3609_v20 }
  0x31   :  { %3635 = vmatprep.subr.bf16.mxu1 %v4187_v0 }
  0x34   :  { %3637 = vmatpush3.bf16.msra.mxu1 %v3612_v25  ;;  %v3967_v25 = vld [vmem:[%s5779_s1 + $0x40] sm:$0xff]  }
  0x35   :  { %3638 = vmatprep.subr.bf16.mxu1 %v4187_v0  ;;  %3377 = vmatprep.subr.bf16.mxu0 %v3967_v25 }
  0x36   :  { %3378 = vmatpush3.bf16.msra.mxu0 %v3968_v26 }
  0x37   :  { %3379 = vmatprep.subr.bf16.mxu0 %v3969_v27 }
  0x38   :  { %3640 = vmatpush3.bf16.msra.mxu1 %v3615_v29  ;;  %v3971_v29 = vld [vmem:[%s5779_s1 + $0x50] sm:$0xff]  }
  0x39   :  { %3641 = vmatprep.subr.bf16.mxu1 %v4187_v0 }
  0x3a   :  { %3380 = vmatpush3.bf16.msra.mxu0 %v3970_v28 }
  0x3b   :  { %3381 = vmatprep.subr.bf16.mxu0 %v3971_v29 }
  0x3c   :  { %3643 = vmatpush3.bf16.msra.mxu1 %v3618_v33  ;;  %v3975_v33 = vld [vmem:[%s5779_s1 + $0x58] sm:$0xff]  }
  0x3d   :  { %3644 = vmatprep.subr.bf16.mxu1 %v4187_v0 }
  0x3e   :  { %3382 = vmatpush3.bf16.msra.mxu0 %v3972_v30 }
  0x3f   :  { %3383 = vmatprep.subr.bf16.mxu0 %v3975_v33 }
  0x40   :  { %3646 = vmatpush3.bf16.msra.mxu1 %v3621_v37  ;;  %v3979_v37 = vld [vmem:[%s5779_s1 + $0x60] sm:$0xff]  }
  0x41   :  { %3405 = vmatprep.subr.bf16.mxu1 %v3973_v31 }
  0x42   :  { %3384 = vmatpush3.bf16.msra.mxu0 %v3976_v34 }
  0x43   :  { %3385 = vmatprep.subr.bf16.mxu0 %v3979_v37 }
  0x46   :  { %3386 = vmatpush3.bf16.msra.mxu0 %v3980_v38 }
  0xf6   :  { %v140_v42 = vpop.f32.mrb[0].mxu1 }
  0xf7   :  { %v147_v43 = vrot.slane %v140_v42, %v4365_v41  ;;  %v3517_v44 = vpop.f32.mrb[1].mxu1  ;;  %v3981_v42 = vld [vmem:[%s5779_s1 + $0xd0] sm:$0xff]  }
  0xf8   :  { %v3983_v44 = vld [vmem:[%s5779_s1 + $0x68] sm:$0xff]  }
  0xf9   :  { %v148_v45 = vsub.f32 %v4294_v10, %v147_v43  ;;  %v149_v46 = vsub.f32 %v4299_v11, %v147_v43  ;;  %v150_v47 = vsub.f32 %v4304_v12, %v147_v43  ;;  %v151_v48 = vsub.f32 %v4311_v15, %v147_v43  ;;  %v3172_v10 = vld [vmem:[%s5778_s8] ss:$0 sm:$0xff]  ;;  %v3982_v43 = vld [vmem:[%s5779_s1 + $0x90] sm:$0xff]   ;;  %3387 = vmatprep.subr.bf16.mxu0 %v3983_v44 }
  0xfb   :  { %v152_v49 = vmul.f32 %v148_v45, %v148_v45  ;;  %v153_v50 = vmul.f32 %v149_v46, %v149_v46  ;;  %v154_v51 = vmul.f32 %v150_v47, %v150_v47  ;;  %v155_v53 = vmul.f32 %v151_v48, %v151_v48 }
  0xfd   :  { %v156_v52 = vadd.f32 %v153_v50, %v152_v49  ;;  %v3988_v49 = vld [vmem:[%s5779_s1 + $0x30] sm:$0xff]   ;;  %v3989_v50 = vld [vmem:[%s5779_s1 + $0xe0] sm:$0xff]  }
  0xff   :  { %v157_v54 = vadd.f32 %v156_v52, %v154_v51  ;;  %v3990_v51 = vld [vmem:[%s5779_s1 + $0xa0] sm:$0xff]  }
 0x101   :  { %v158_v55 = vadd.f32 %v157_v54, %v155_v53 }
 0x103   :  { %v159_v56 = vrot.slane %v158_v55, 4 }
 0x105   :  { %v160_v57 = vadd.f32 %v159_v56, %v158_v55  ;;  %v3991_v56 = vld [vmem:[%s5779_s1 + $0x78] sm:$0xff]  }
 0x107   :  { %v161_v58 = vrot.slane %v160_v57, 2 }
 0x109   :  { %v162_v59 = vadd.f32 %v161_v58, %v160_v57  ;;  %v3992_v57 = vld [vmem:[%s5779_s1 + $0x38] sm:$0xff]   ;;  %v3993_v58 = vld [vmem:[%s5779_s1 + $0xe8] sm:$0xff]  }
 0x10b   :  { %v163_v60 = vrot.slane %v162_v59, 1 }
 0x10d   :  { %v164_v61 = vadd.f32 %v163_v60, %v162_v59 }
 0x10f   :  { %3551 = vmatmul.mubr.f32.vlgmr.msra.gmra.mrb[2].mxu1 %v164_v61 }
 0x110   :  { %3406 = vmatpush3.bf16.msra.mxu1 %v3974_v32 }
 0x111   :  { %3407 = vmatprep.subr.bf16.mxu1 %v3977_v35 }
 0x114   :  { %3408 = vmatpush3.bf16.msra.mxu1 %v3978_v36 }
 0x115   :  { %3409 = vmatprep.subr.bf16.mxu1 %v3981_v42 }
 0x118   :  { %3410 = vmatpush3.bf16.msra.mxu1 %v3982_v43 }
 0x1e2   :  { %v231_v62 = vpop.f32.mrb[2].mxu1 }
 0x1e3   :  { %v232_v63 = vadd.f32 1e-05, %v231_v62  ;;  %v3552_v1 = vpop.f32.mrb[3].mxu1 }
 0x1e5   :  { %4179 = vrsqrt.f32 %v232_v63 }
 0x1ef   :  { %v4180_v2 = vpop.eup %4179 }
 0x1f0   :  { %v239_v3 = vrot.slane %v4180_v2, %v4365_v41  ;;  %v3994_v2 = vld [vmem:[%s5779_s1 + $0xa8] sm:$0xff]  }
 0x1f2   :  { %v241_v6 = vmul.f32 %v239_v3, %v149_v46  ;;  %v240_v7 = vmul.f32 %v239_v3, %v148_v45  ;;  %v242_v8 = vmul.f32 %v239_v3, %v150_v47  ;;  %v243_v9 = vmul.f32 %v239_v3, %v151_v48  ;;  %v3984_v45 = vld [vmem:[%s5779_s1 + $0x28] sm:$0xff]   ;;  %v3985_v46 = vld [vmem:[%s5779_s1 + $0xd8] sm:$0xff]   ;;  %v3987_v48 = vld [vmem:[%s5779_s1 + $0x70] sm:$0xff]  }
 0x1f3   :  { %v3986_v47 = vld [vmem:[%s5779_s1 + $0x98] sm:$0xff]   ;;  %3411 = vmatprep.subr.bf16.mxu1 %v3985_v46  ;;  %3388 = vmatpush3.bf16.msra.mxu0 %v3984_v45 }
 0x1f4   :  { %v252_v11 = vmul.f32 %v3171_v5, %v241_v6  ;;  %v251_v12 = vmul.f32 %v3171_v5, %v240_v7  ;;  %v253_v13 = vmul.f32 %v3171_v5, %v242_v8  ;;  %v254_v14 = vmul.f32 %v3171_v5, %v243_v9  ;;  %3412 = vmatpush3.bf16.msra.mxu1 %v3986_v47 }
 0x1f5   :  { %3389 = vmatprep.subr.bf16.mxu0 %v3987_v48  ;;  %3413 = vmatprep.subr.bf16.mxu1 %v3989_v50 }
 0x1f6   :  { %v263_v15 = vadd.f32 %v3172_v10, %v252_v11  ;;  %v262_v16 = vadd.f32 %v3172_v10, %v251_v12  ;;  %v264_v19 = vadd.f32 %v3172_v10, %v253_v13  ;;  %v265_v20 = vadd.f32 %v3172_v10, %v254_v14 }
 0x1f7   :  { %3390 = vmatpush3.bf16.msra.mxu0 %v3988_v49 }
 0x1f8   :  { %v300_v17 = vrot.slane %v263_v15, 6  ;;  %v299_v18 = vrot.slane %v262_v16, 6  ;;  %v302_v21 = vrot.slane %v264_v19, 6  ;;  %v303_v23 = vrot.slane %v265_v20, 6  ;;  %3414 = vmatpush3.bf16.msra.mxu1 %v3990_v51  ;;  %3391 = vmatprep.subr.bf16.mxu0 %v3991_v56 }
 0x1f9   :  { %3415 = vmatprep.subr.bf16.mxu1 %v3993_v58 }
 0x1fa   :  { %309 = vrot.lane.b32.xlu1 %v300_v17, %s4190_s7  ;;  %305 = vrot.lane.b32.xlu0 %v299_v18, %s4190_s7  ;;  %v301_v22 = vsel %vm298_vm9, %v299_v18, %v300_v17  ;;  %v304_v24 = vsel %vm298_vm9, %v302_v21, %v303_v23 }
 0x1fb   :  { %3392 = vmatpush3.bf16.msra.mxu0 %v3992_v57 }
 0x1fc   :  { %3416 = vmatpush3.bf16.msra.mxu1 %v3994_v2  ;;  %v3998_v2 = vld [vmem:[%s5779_s1 + $0xb0] sm:$0xff]  }
 0x1fe   :  { %311 = vrot.lane.b32.xlu1 %v302_v21, %s4190_s7  ;;  %307 = vrot.lane.b32.xlu0 %v301_v22, %s4190_s7 }
 0x202   :  { %315 = vrot.lane.b32.xlu1 %v303_v23, %s4190_s7  ;;  %313 = vrot.lane.b32.xlu0 %v304_v24, %s4190_s7 }
 0x26c   :  { %v310_v52 = vpop.permute.xlu1 %309  ;;  %v306_v53 = vpop.permute.xlu0 %305 }
 0x26d   :  { %330 = vst.msk [vmem:[#allocation2 + $0x20] sm:$0x3] %vm329_vm10, %v310_v52 }
 0x26e   :  { %331 = vst.msk [vmem:[#allocation2 + $0x28] sm:$0x3] %vm280_vm1, %v310_v52 }
 0x26f   :  { %324 = vst.msk [vmem:[#allocation2] sm:$0xfc] %vm323_vm11, %v306_v53 }
 0x270   :  { %325 = vst.msk [vmem:[#allocation2 + $0x8] sm:$0xfc] %vm276_vm3, %v306_v53  ;;  %v312_v54 = vpop.permute.xlu1 %311  ;;  %v308_v55 = vpop.permute.xlu0 %307 }
 0x271   :  { %332 = vst.msk [vmem:[#allocation2 + $0x30] sm:$0xfc] %vm323_vm11, %v312_v54 }
 0x272   :  { %333 = vst.msk [vmem:[#allocation2 + $0x38] sm:$0xfc] %vm276_vm3, %v312_v54  ;;  %vm477_vm3 = vcmask 1043456  }
 0x273   :  { %327 = vst.msk [vmem:[#allocation2 + $0x10] sm:$0xff] %vm326_vm12, %v308_v55 }
 0x274   :  { %328 = vst.msk [vmem:[#allocation2 + $0x18] sm:$0xff] %vm278_vm6, %v308_v55  ;;  %v316_v59 = vpop.permute.xlu1 %315  ;;  %v314_v60 = vpop.permute.xlu0 %313  ;;  %v348_v1 = vld [vmem:[#allocation2 + $0x20] sm:$0x1] }
 0x275   :  { %336 = vst.msk [vmem:[#allocation2 + $0x50] sm:$0x3] %vm329_vm10, %v316_v59  ;;  %v349_v7 = vld [vmem:[#allocation2 + $0x28] sm:$0x1]  ;;  %v373_v9 = vrot.slane %v348_v1, 1  ;;  %v3995_v55 = vld [vmem:[%s5779_s1 + $0x140] sm:$0xff]  }
 0x276   :  { %v387_v61 = vld [vmem:[#allocation2] sm:$0xfc]  ;;  %337 = vst.msk [vmem:[#allocation2 + $0x58] sm:$0x3] %vm280_vm1, %v316_v59  ;;  %v389_v10 = vld [vmem:[#allocation2 + $0x20] sm:$0x3]  ;;  %3433 = vmatprep.subr.bf16.mxu0 %v3995_v55 }
 0x277   :  { %v388_v62 = vld [vmem:[#allocation2 + $0x8] sm:$0xfc]  ;;  %v346_v63 = vld [vmem:[#allocation2] sm:$0xfe]  ;;  %334 = vst.msk [vmem:[#allocation2 + $0x40] sm:$0xff] %vm326_vm12, %v314_v60  ;;  %v404_v3 = vrot.slane %v387_v61, 2 }
 0x278   :  { %335 = vst.msk [vmem:[#allocation2 + $0x48] sm:$0xff] %vm278_vm6, %v314_v60  ;;  %v407_v5 = vrot.slane %v388_v62, 2  ;;  %v347_v6 = vld [vmem:[#allocation2 + $0x8] sm:$0xfe]  ;;  %v367_v8 = vrot.slane %v346_v63, 1  ;;  %v375_v15 = vrot.slane %v349_v7, 1 }
 0x279   :  { %v390_v11 = vld [vmem:[#allocation2 + $0x28] sm:$0x3]  ;;  %v370_v14 = vrot.slane %v347_v6, 1  ;;  %v424_v16 = vld [vmem:[#allocation2] sm:$0xf8]  ;;  %v410_v21 = vrot.slane %v389_v10, 2 }
 0x27a   :  { %v4507_v12 = vld [vmem:[#allocation2 + $0x10] sm:$0xff]  ;;  %v412_v22 = vrot.slane %v390_v11, 2  ;;  %v426_v23 = vld [vmem:[#allocation2 + $0x20] sm:$0x7]  ;;  %v441_v24 = vrot.slane %v424_v16, 3  ;;  %vm522_vm1 = vcmask 261120  }
 0x27b   :  { %v4509_v13 = vld [vmem:[#allocation2 + $0x18] sm:$0xff]  ;;  %v405_v17 = vrot.slane %v4507_v12, 2  ;;  %v368_v19 = vrot.slane %v4507_v12, 1  ;;  %v442_v25 = vrot.slane %v4507_v12, 3  ;;  %v350_v30 = vld [vmem:[#allocation2 + $0x30] sm:$0xfe] }
 0x27c   :  { %v408_v18 = vrot.slane %v4509_v13, 2  ;;  %v371_v20 = vrot.slane %v4509_v13, 1  ;;  %v352_v36 = vld [vmem:[#allocation2 + $0x50] sm:$0x1]  ;;  %v447_v42 = vrot.slane %v426_v23, 3  ;;  %v377_v48 = vrot.slane %v350_v30, 1 }
 0x27d   :  { %v406_v26 = vsel %vm403_vm13, %v404_v3, %v405_v17  ;;  %v369_v28 = vsel %vm366_vm14, %v367_v8, %v368_v19  ;;  %v374_v29 = vsel %vm366_vm14, %v368_v19, %v373_v9  ;;  %v411_v37 = vsel %vm403_vm13, %v405_v17, %v410_v21  ;;  %v393_v44 = vld [vmem:[#allocation2 + $0x50] sm:$0x3]  ;;  %v394_v45 = vld [vmem:[#allocation2 + $0x58] sm:$0x3]  ;;  %v391_v54 = vld [vmem:[#allocation2 + $0x30] sm:$0xfc] }
 0x27e   :  { %v409_v27 = vsel %vm403_vm13, %v407_v5, %v408_v18  ;;  %v3847_v32 = vpack.i.bf16 %v374_v29, %v369_v28  ;;  %v372_v33 = vsel %vm366_vm14, %v370_v14, %v371_v20  ;;  %v376_v34 = vsel %vm366_vm14, %v371_v20, %v375_v15  ;;  %v4522_v35 = vld [vmem:[#allocation2 + $0x40] sm:$0xff]  ;;  %v392_v60 = vld [vmem:[#allocation2 + $0x38] sm:$0xfc]  ;;  %v430_v62 = vld [vmem:[#allocation2 + $0x50] sm:$0x7] }
 0x27f   :  { %v3852_v31 = vpack.i.bf16 %v409_v27, %v406_v26  ;;  %v413_v38 = vsel %vm403_vm13, %v408_v18, %v412_v22  ;;  %v4526_v43 = vld [vmem:[#allocation2 + $0x48] sm:$0xff]  ;;  %v3862_v46 = vpack.i.bf16 %v376_v34, %v372_v33  ;;  %v443_v47 = vsel %vm440_vm15, %v441_v24, %v442_v25  ;;  %v3996_v63 = vld [vmem:[%s5779_s1 + $0xf0] sm:$0xff]   ;;  %v353_v1 = vld [vmem:[#allocation2 + $0x58] sm:$0x1] }
 0x280   :  { %3848 = vrot.lane.b32.xlu0 %v3847_v32, %s4192_s30  ;;  %v378_v49 = vrot.slane %v4522_v35, 1  ;;  %v3857_v50 = vpack.i.bf16 %v413_v38, %v411_v37  ;;  %v448_v51 = vsel %vm440_vm15, %v442_v25, %v447_v42  ;;  %v383_v52 = vrot.slane %v352_v36, 1  ;;  %v428_v8 = vld [vmem:[#allocation2 + $0x30] sm:$0xf8]  ;;  %3417 = vmatprep.subr.bf16.mxu1 %v3996_v63  ;;  %v4000_v9 = vld [vmem:[%s5779_s1 + $0xf8] sm:$0xff]   ;;  %v4568_v33 = vld [vmem:[%s5779_s1 + $0x180] sm:$0xff]  }
 0x281   :  { %3853 = vrot.lane.b32.xlu1 %v3852_v31, %s4191_s4  ;;  %v415_v53 = vrot.slane %v4522_v35, 2  ;;  %v418_v57 = vrot.slane %v4526_v43, 2  ;;  %v420_v58 = vrot.slane %v393_v44, 2  ;;  %v422_v59 = vrot.slane %v394_v45, 2  ;;  %v351_v16 = vld [vmem:[#allocation2 + $0x38] sm:$0xfe]  ;;  %3418 = vmatpush3.bf16.msra.mxu1 %v3998_v2 }
 0x282   :  { %v379_v56 = vsel %vm366_vm14, %v377_v48, %v378_v49  ;;  %v384_v61 = vsel %vm366_vm14, %v378_v49, %v383_v52  ;;  %v3872_v3 = vpack.i.bf16 %v448_v51, %v443_v47  ;;  %v414_v6 = vrot.slane %v391_v54, 2  ;;  %v4002_v17 = vld [vmem:[%s5779_s1 + $0xb8] sm:$0xff]   ;;  %3419 = vmatprep.subr.bf16.mxu1 %v4000_v9  ;;  %v425_v31 = vld [vmem:[#allocation2 + $0x8] sm:$0xf8]  ;;  %v427_v32 = vld [vmem:[#allocation2 + $0x28] sm:$0x7] }
 0x283   :  { %v3867_v5 = vpack.i.bf16 %v384_v61, %v379_v56  ;;  %v417_v7 = vrot.slane %v392_v60, 2  ;;  %v421_v10 = vsel %vm403_vm13, %v415_v53, %v420_v58  ;;  %v423_v11 = vsel %vm403_vm13, %v418_v57, %v422_v59  ;;  %v431_v23 = vld [vmem:[#allocation2 + $0x58] sm:$0x7]  ;;  %v429_v25 = vld [vmem:[#allocation2 + $0x38] sm:$0xf8]  ;;  %v339_v58 = vld [vmem:[#allocation2 + $0x8] sm:$0xff] }
 0x284   :  { %3858 = vrot.lane.b32.xlu0 %v3857_v50, %s4191_s4  ;;  %v452_v14 = vrot.slane %v4522_v35, 3  ;;  %v457_v15 = vrot.slane %v430_v62, 3  ;;  %v416_v18 = vsel %vm403_vm13, %v414_v6, %v415_v53  ;;  %v381_v20 = vrot.slane %v4526_v43, 1  ;;  %v338_v61 = vld [vmem:[#allocation2] sm:$0xff]  ;;  %v3999_v9 = vld [vmem:[%s5779_s1 + $0x148] sm:$0xff]  }
 0x285   :  { %3863 = vrot.lane.b32.xlu1 %v3862_v46, %s4192_s30  ;;  %v419_v19 = vsel %vm403_vm13, %v417_v7, %v418_v57  ;;  %v385_v21 = vrot.slane %v353_v1, 1  ;;  %v451_v22 = vrot.slane %v428_v8, 3  ;;  %v380_v24 = vrot.slane %v351_v16, 1  ;;  %3420 = vmatpush3.bf16.msra.mxu1 %v4002_v17 }
 0x286   :  { %v445_v26 = vrot.slane %v4509_v13, 3  ;;  %v3882_v27 = vpack.i.bf16 %v423_v11, %v421_v10  ;;  %v3877_v28 = vpack.i.bf16 %v419_v19, %v416_v18  ;;  %v458_v30 = vsel %vm440_vm15, %v452_v14, %v457_v15  ;;  %3553 = vmatprep.subr.bf16.mxu1 %v4568_v33  ;;  %v461_v10 = vld [vmem:[#allocation2] sm:$0xf0]  ;;  %v4001_v19 = vld [vmem:[%s5779_s1 + $0x108] sm:$0xff]  }
 0x287   :  { %v453_v29 = vsel %vm440_vm15, %v451_v22, %v452_v14  ;;  %v382_v34 = vsel %vm366_vm14, %v380_v24, %v381_v20  ;;  %v386_v36 = vsel %vm366_vm14, %v381_v20, %v385_v21  ;;  %v455_v37 = vrot.slane %v4526_v43, 3  ;;  %v463_v20 = vld [vmem:[#allocation2 + $0x20] sm:$0xf] }
 0x288   :  { %3868 = vrot.lane.b32.xlu0 %v3867_v5, %s4192_s30  ;;  %v459_v38 = vrot.slane %v431_v23, 3  ;;  %v454_v42 = vrot.slane %v429_v25, 3  ;;  %v444_v44 = vrot.slane %v425_v31, 3  ;;  %v449_v45 = vrot.slane %v427_v32, 3  ;;  %v343_v31 = vld [vmem:[#allocation2 + $0x38] sm:$0xff] }
 0x289   :  { %3873 = vrot.lane.b32.xlu1 %v3872_v3, %s4193_s22  ;;  %v3892_v46 = vpack.i.bf16 %v458_v30, %v453_v29  ;;  %v3887_v47 = vpack.i.bf16 %v386_v36, %v382_v34  ;;  %v605_v2 = vpack.c.bf16 %v4507_v12, %v338_v61  ;;  %v3997_v3 = vld [vmem:[%s5779_s1 + $0x100] sm:$0xff]   ;;  %v478_v21 = vrot.slane %v461_v10, 4 }
 0x28a   :  { %v456_v48 = vsel %vm440_vm15, %v454_v42, %v455_v37  ;;  %v460_v49 = vsel %vm440_vm15, %v455_v37, %v459_v38  ;;  %v446_v50 = vsel %vm440_vm15, %v444_v44, %v445_v26  ;;  %v450_v51 = vsel %vm440_vm15, %v445_v26, %v449_v45 }
 0x28b   :  { %v3902_v52 = vpack.i.bf16 %v460_v49, %v456_v48  ;;  %v3897_v53 = vpack.i.bf16 %v450_v51, %v446_v50  ;;  %v479_v22 = vrot.slane %v4507_v12, 4  ;;  %v484_v37 = vrot.slane %v463_v20, 4 }
 0x28c   :  { %3878 = vrot.lane.b32.xlu0 %v3877_v28, %s4191_s4 }
 0x28d   :  { %3883 = vrot.lane.b32.xlu1 %v3882_v27, %s4191_s4  ;;  %v4003_v27 = vld [vmem:[%s5779_s1 + $0x150] sm:$0xff]   ;;  %v480_v50 = vsel %vm477_vm3, %v478_v21, %v479_v22  ;;  %v485_v51 = vsel %vm477_vm3, %v479_v22, %v484_v37  ;;  %v4008_v22 = vld [vmem:[%s5779_s1 + $0x120] sm:$0xff]  }
 0x290   :  { %3888 = vrot.lane.b32.xlu0 %v3887_v47, %s4192_s30  ;;  %v482_v47 = vrot.slane %v4509_v13, 4 }
 0x291   :  { %3893 = vrot.lane.b32.xlu1 %v3892_v46, %s4193_s22  ;;  %v4004_v46 = vld [vmem:[%s5779_s1 + $0x110] sm:$0xff]  }
 0x294   :  { %3898 = vrot.lane.b32.xlu0 %v3897_v53, %s4193_s22  ;;  %v462_v53 = vld [vmem:[#allocation2 + $0x8] sm:$0xf0] }
 0x295   :  { %3903 = vrot.lane.b32.xlu1 %v3902_v52, %s4193_s22  ;;  %v4005_v52 = vld [vmem:[%s5779_s1 + $0x158] sm:$0xff]  }
 0x2f2   :  { %v3849_v55 = vpop.permute.xlu0 %3848 }
 0x2f3   :  { %v3854_v54 = vpop.permute.xlu1 %3853  ;;  %v3851_v56 = vunpack.i.h.bf16 %v3849_v55  ;;  %v3850_v57 = vunpack.i.l.bf16 %v3849_v55 }
 0x2f4   :  { %v3856_v5 = vunpack.i.h.bf16 %v3854_v54  ;;  %v3855_v6 = vunpack.i.l.bf16 %v3854_v54 }
 0x2f5   :  { %v593_v59 = vsel %vm522_vm1, %v339_v58, %v3850_v57  ;;  %v594_v60 = vsel %vm522_vm1, %v4509_v13, %v3851_v56  ;;  %v342_v58 = vld [vmem:[#allocation2 + $0x30] sm:$0xff] }
 0x2f6   :  { %v3859_v63 = vpop.permute.xlu0 %3858  ;;  %v606_v1 = vpack.c.bf16 %v594_v60, %v593_v59  ;;  %v552_v23 = vsel %vm551_vm2, %v3855_v6, %v3856_v5  ;;  %v612_v13 = vpack.c.bf16 %v4522_v35, %v342_v58  ;;  %v464_v59 = vld [vmem:[#allocation2 + $0x28] sm:$0xf] }
 0x2f7   :  { %v3864_v62 = vpop.permute.xlu1 %3863  ;;  %v3861_v11 = vunpack.i.h.bf16 %v3859_v63  ;;  %v3860_v14 = vunpack.i.l.bf16 %v3859_v63  ;;  %v4012_v60 = vld [vmem:[%s5779_s1 + $0x188] sm:$0xff]   ;;  %v610_v63 = vpack.c.bf16 %v485_v51, %v480_v50  ;;  %v489_v50 = vrot.slane %v4522_v35, 4 }
 0x2f8   :  { %v3866_v7 = vunpack.i.h.bf16 %v3864_v62  ;;  %v3865_v8 = vunpack.i.l.bf16 %v3864_v62  ;;  %1057 = vmatprep.mubr.bf16.mxu0 %v606_v1  ;;  %v4006_v1 = vld [vmem:[%s5779_s1 + $0x118] sm:$0xff]  }
 0x2f9   :  { %1058 = vmatmul.mubr.bf16.vlgmr.msra.gmra.mrb[0].mxu0 %v605_v2  ;;  %v553_v28 = vsel %vm551_vm2, %v3860_v14, %v3861_v11  ;;  %v481_v2 = vrot.slane %v462_v53, 4 }
 0x2fa   :  { %v523_v15 = vsel %vm522_vm1, %v3850_v57, %v3865_v8  ;;  %v524_v16 = vsel %vm522_vm1, %v3851_v56, %v3866_v7  ;;  %3434 = vmatpush3.bf16.msra.mxu0 %v3997_v3  ;;  %v4598_v18 = vpop.permute.xlu0 %3868  ;;  %v4007_v8 = vld [vmem:[%s5779_s1 + $0x160] sm:$0xff]  }
 0x2fb   :  { %v4596_v17 = vpop.permute.xlu1 %3873  ;;  %v3871_v26 = vunpack.i.h.bf16 %v4598_v18  ;;  %3435 = vmatprep.subr.bf16.mxu0 %v3999_v9  ;;  %v597_v29 = vsel %vm551_vm2, %v523_v15, %v3855_v6  ;;  %v598_v30 = vsel %vm551_vm2, %v524_v16, %v3860_v14  ;;  %v3870_v12 = vunpack.i.l.bf16 %v4598_v18 }
 0x2fc   :  { %v3876_v24 = vunpack.i.h.bf16 %v4596_v17  ;;  %v3875_v25 = vunpack.i.l.bf16 %v4596_v17  ;;  %v607_v48 = vpack.c.bf16 %v598_v30, %v597_v29  ;;  %v483_v11 = vsel %vm477_vm3, %v481_v2, %v482_v47  ;;  %v466_v29 = vld [vmem:[#allocation2 + $0x38] sm:$0xf0] }
 0x2fd   :  { %v596_v32 = vsel %vm522_vm1, %v4526_v43, %v3871_v26  ;;  %v595_v44 = vsel %vm522_vm1, %v343_v31, %v3870_v12  ;;  %v486_v14 = vrot.slane %v464_v59, 4  ;;  %v492_v30 = vrot.slane %v4526_v43, 4 }
 0x2fe   :  { %v601_v34 = vsel %vm580_vm4, %v552_v23, %v3875_v25  ;;  %v602_v36 = vsel %vm580_vm4, %v553_v28, %v3876_v24  ;;  %3436 = vmatpush3.bf16.msra.mxu0 %v4001_v19  ;;  %v3879_v42 = vpop.permute.xlu0 %3878  ;;  %v613_v57 = vpack.c.bf16 %v596_v32, %v595_v44  ;;  %v4011_v32 = vld [vmem:[%s5779_s1 + $0x128] sm:$0xff]   ;;  %v467_v44 = vld [vmem:[#allocation2 + $0x50] sm:$0xf] }
 0x2ff   :  { %v3884_v38 = vpop.permute.xlu1 %3883  ;;  %v608_v45 = vpack.c.bf16 %v602_v36, %v601_v34  ;;  %3437 = vmatprep.subr.bf16.mxu0 %v4003_v27  ;;  %v3881_v55 = vunpack.i.h.bf16 %v3879_v42  ;;  %v3880_v56 = vunpack.i.l.bf16 %v3879_v42  ;;  %v487_v23 = vsel %vm477_vm3, %v482_v47, %v486_v14  ;;  %v4010_v27 = vld [vmem:[%s5779_s1 + $0x168] sm:$0xff]   ;;  %v4013_v34 = vld [vmem:[%s5779_s1 + $0x170] sm:$0xff]  }
 0x300   :  { %v3886_v49 = vunpack.i.h.bf16 %v3884_v38  ;;  %v3885_v54 = vunpack.i.l.bf16 %v3884_v38  ;;  %1065 = vmatprep.mubr.bf16.mxu0 %v613_v57  ;;  %v491_v36 = vrot.slane %v466_v29, 4  ;;  %v4014_v42 = vld [vmem:[%s5779_s1 + $0x130] sm:$0xff]   ;;  %v494_v51 = vrot.slane %v467_v44, 4 }
 0x301   :  { %1106 = vmatprep.mubr.bf16.mxu1 %v608_v45  ;;  %1066 = vmatmul.mubr.bf16.gmra.mrb[4].mxu0 %v612_v13  ;;  %v554_v10 = vsel %vm551_vm2, %v3880_v56, %v3881_v55  ;;  %v4015_v45 = vld [vmem:[%s5779_s1 + $0x178] sm:$0xff]  }
 0x302   :  { %1107 = vmatmul.mubr.bf16.vlgmr.msra.gmra.mrb[4].mxu1 %v607_v48  ;;  %3438 = vmatpush3.bf16.msra.mxu0 %v4004_v46  ;;  %v3889_v62 = vpop.permute.xlu0 %3888  ;;  %v555_v9 = vsel %vm551_vm2, %v3885_v54, %v3886_v49  ;;  %v493_v43 = vsel %vm477_vm3, %v491_v36, %v492_v30  ;;  %v465_v49 = vld [vmem:[#allocation2 + $0x30] sm:$0xf0]  ;;  %v495_v57 = vsel %vm477_vm3, %v489_v50, %v494_v51 }
 0x303   :  { %v4637_v61 = vpop.permute.xlu1 %3893  ;;  %v3891_v6 = vunpack.i.h.bf16 %v3889_v62  ;;  %v3890_v7 = vunpack.i.l.bf16 %v3889_v62  ;;  %3439 = vmatprep.subr.bf16.mxu0 %v4005_v52  ;;  %1155 = vmatprep.mubr.bf16.mxu0 %v610_v63  ;;  %v4016_v52 = vld [vmem:[%s5779_s1 + $0x138] sm:$0xff]   ;;  %v488_v53 = vrot.slane %v465_v49, 4  ;;  %v1238_v62 = vld [vmem:[%s5780_s5] sm:$0xff]  ;;  %v1239_v63 = vld [vmem:[%s5780_s5 + $0x8] sm:$0xff] }
 0x304   :  { %v3896_v3 = vunpack.i.h.bf16 %v4637_v61  ;;  %v3895_v5 = vunpack.i.l.bf16 %v4637_v61  ;;  %3554 = vmatpush3.bf16.msra.mxu1 %v4568_v33  ;;  %v4715_v2 = vpack.c.bf16 %v1239_v63, %v1238_v62  ;;  %v1241_v61 = vld [vmem:[%s5780_s5 + $0x18] sm:$0xff] }
 0x305   :  { %v525_v15 = vsel %vm522_vm1, %v3870_v12, %v3890_v7  ;;  %v526_v16 = vsel %vm522_vm1, %v3871_v26, %v3891_v6  ;;  %3555 = vmatprep.subr.bf16.mxu1 %v4012_v60  ;;  %v468_v26 = vld [vmem:[#allocation2 + $0x58] sm:$0xf]  ;;  %v611_v12 = vpack.c.bf16 %v487_v23, %v483_v11  ;;  %v1243_v6 = vld [vmem:[%s5780_s5 + $0x28] sm:$0xff] }
 0x306   :  { %v603_v18 = vsel %vm580_vm4, %v554_v10, %v3895_v5  ;;  %v604_v19 = vsel %vm580_vm4, %v555_v9, %v3896_v3  ;;  %3440 = vmatpush3.bf16.msra.mxu0 %v4006_v1  ;;  %v599_v33 = vsel %vm551_vm2, %v525_v15, %v3880_v56  ;;  %v600_v21 = vsel %vm551_vm2, %v526_v16, %v3885_v54  ;;  %v3899_v37 = vpop.permute.xlu0 %3898  ;;  %v1240_v1 = vld [vmem:[%s5780_s5 + $0x10] sm:$0xff]  ;;  %v1245_v9 = vld [vmem:[%s5780_s5 + $0x38] sm:$0xff] }
 0x307   :  { %v615_v20 = vpack.c.bf16 %v604_v19, %v603_v18  ;;  %3441 = vmatprep.subr.bf16.mxu0 %v4007_v8  ;;  %v614_v28 = vpack.c.bf16 %v600_v21, %v599_v33  ;;  %v496_v31 = vrot.slane %v468_v26, 4  ;;  %v3901_v46 = vunpack.i.h.bf16 %v3899_v37  ;;  %v3904_v55 = vpop.permute.xlu1 %3903  ;;  %v1244_v8 = vld [vmem:[%s5780_s5 + $0x30] sm:$0xff] }
 0x308   :  { %3556 = vmatpush3.bf16.msra.mxu1 %v4012_v60  ;;  %v3900_v47 = vunpack.i.l.bf16 %v3899_v37  ;;  %v490_v56 = vsel %vm477_vm3, %v488_v53, %v489_v50  ;;  %v3906_v13 = vunpack.i.h.bf16 %v3904_v55  ;;  %v3905_v59 = vunpack.i.l.bf16 %v3904_v55 }
 0x309   :  { %1114 = vmatprep.mubr.bf16.mxu1 %v615_v20  ;;  %3647 = vmatprep.subr.bf16.mxu1 %v4187_v0  ;;  %v497_v38 = vsel %vm477_vm3, %v492_v30, %v496_v31  ;;  %v582_v54 = vsel %vm580_vm4, %v3876_v24, %v3901_v46  ;;  %v617_v60 = vpack.c.bf16 %v495_v57, %v490_v56  ;;  %vm1928_vm3 = vcmask 130049  }
 0x30a   :  { %1115 = vmatmul.mubr.bf16.gmra.mrb[8].mxu1 %v614_v28  ;;  %3442 = vmatpush3.bf16.msra.mxu0 %v4008_v22  ;;  %v618_v48 = vpack.c.bf16 %v497_v38, %v493_v43  ;;  %v581_v35 = vsel %vm580_vm4, %v3875_v25, %v3900_v47  ;;  %v583_v24 = vsel %vm580_vm4, %v3895_v5, %v3905_v59  ;;  %v1242_v5 = vld [vmem:[%s5780_s5 + $0x20] sm:$0xff] }
 0x30b   :  { %3557 = vmatprep.mubr.msk.bf16.mxu1 %vm522_vm1, %v611_v12  ;;  %3443 = vmatprep.subr.bf16.mxu0 %v4010_v27  ;;  %v609_v58 = vpack.c.bf16 %v582_v54, %v581_v35  ;;  %v584_v17 = vsel %vm580_vm4, %v3896_v3, %v3906_v13  ;;  %v4721_v3 = vpack.c.bf16 %v1241_v61, %v1240_v1 }
 0x30c   :  { %v616_v25 = vpack.c.bf16 %v584_v17, %v583_v24  ;;  %v4731_v7 = vpack.c.bf16 %v1243_v6, %v1242_v5  ;;  %v4741_v10 = vpack.c.bf16 %v1245_v9, %v1244_v8  ;;  %1929 = vst.msk [vmem:[#allocation3] sm:$0xfe] %vm1928_vm3, %v4189_v4  ;;  %1933 = vst.msk [vmem:[#allocation3 + $0x48] sm:$0xfe] %vm1928_vm3, %v4189_v4 }
 0x30e   :  { %3444 = vmatpush3.bf16.msra.mxu0 %v4011_v32 }
 0x30f   :  { %3445 = vmatprep.subr.bf16.mxu0 %v4013_v34 }
 0x312   :  { %3446 = vmatpush3.bf16.msra.mxu0 %v4014_v42  ;;  %3558 = vmatmul.mubr.msk.bf16.vlgmr.msra.gmra.mrb[12].mxu1 %vm522_vm1, %v618_v48 }
 0x313   :  { %3447 = vmatprep.subr.bf16.mxu0 %v4015_v45  ;;  %3577 = vmatprep.mubr.msk.f32.mxu1 %vm4188_vm0, %v4189_v4 }
 0x314   :  { %3649 = vmatpush3.bf16.msra.mxu1 %v4715_v2 }
 0x315   :  { %3650 = vmatprep.subr.bf16.mxu1 %v4187_v0 }
 0x316   :  { %3448 = vmatpush3.bf16.msra.mxu0 %v4016_v52 }
 0x318   :  { %3652 = vmatpush3.bf16.msra.mxu1 %v4721_v3 }
 0x319   :  { %1156 = vmatmul.mubr.bf16.vlgmr.msra.gmra.mrb[8].mxu0 %v609_v58  ;;  %3653 = vmatprep.subr.bf16.mxu1 %v4187_v0 }
 0x31a   :  { %1163 = vmatprep.mubr.bf16.mxu0 %v617_v60 }
 0x31c   :  { %3655 = vmatpush3.bf16.msra.mxu1 %v4731_v7 }
 0x31d   :  { %3656 = vmatprep.subr.bf16.mxu1 %v4187_v0 }
 0x320   :  { %3658 = vmatpush3.bf16.msra.mxu1 %v4741_v10 }
 0x321   :  { %1164 = vmatmul.mubr.bf16.gmra.mrb[12].mxu0 %v616_v25  ;;  %3659 = vmatprep.subr.bf16.mxu1 %v4187_v0 }
 0x3cc   :  { %v3393_v11 = vpop.f32.mrb[0].mxu0 }
 0x3cd   :  { %v3394_v14 = vpop.f32.mrb[1].mxu0 }
 0x3ce   :  { %v3395_v15 = vadd.f32 %v3394_v14, %v3393_v11  ;;  %v3396_v16 = vpop.f32.mrb[2].mxu0 }
 0x3cf   :  { %v3397_v18 = vpop.f32.mrb[3].mxu0 }
 0x3d0   :  { %v3398_v19 = vadd.f32 %v3397_v18, %v3396_v16 }
 0x3d4   :  { %v3399_v21 = vpop.f32.mrb[4].mxu0 }
 0x3d5   :  { %v3421_v20 = vpop.f32.mrb[4].mxu1  ;;  %v3400_v26 = vpop.f32.mrb[5].mxu0 }
 0x3d6   :  { %v3422_v33 = vpop.f32.mrb[5].mxu1  ;;  %v3401_v28 = vadd.f32 %v3400_v26, %v3399_v21  ;;  %v3402_v30 = vpop.f32.mrb[6].mxu0 }
 0x3d7   :  { %v3423_v22 = vadd.f32 %v3422_v33, %v3421_v20  ;;  %v3424_v23 = vpop.f32.mrb[6].mxu1  ;;  %v3403_v31 = vpop.f32.mrb[7].mxu0 }
 0x3d8   :  { %v3425_v27 = vpop.f32.mrb[7].mxu1  ;;  %v3404_v32 = vadd.f32 %v3403_v31, %v3402_v30 }
 0x3d9   :  { %v1109_v29 = vadd.f32 %v3423_v22, %v3395_v15  ;;  %v3426_v12 = vadd.f32 %v3425_v27, %v3424_v23 }
 0x3db   :  { %v1112_v34 = vadd.f32 %v3426_v12, %v3398_v19 }
 0x3dd   :  { %v3427_v36 = vpop.f32.mrb[8].mxu1 }
 0x3de   :  { %v3428_v37 = vpop.f32.mrb[9].mxu1 }
 0x3df   :  { %v3429_v43 = vadd.f32 %v3428_v37, %v3427_v36  ;;  %v3430_v38 = vpop.f32.mrb[10].mxu1 }
 0x3e0   :  { %v3431_v42 = vpop.f32.mrb[11].mxu1 }
 0x3e1   :  { %v1117_v44 = vadd.f32 %v3429_v43, %v3401_v28  ;;  %v3432_v45 = vadd.f32 %v3431_v42, %v3430_v38 }
 0x3e3   :  { %v1120_v46 = vadd.f32 %v3432_v45, %v3404_v32 }
 0x3e5   :  { %v3559_v47 = vpop.f32.mrb[12].mxu1 }
 0x3e6   :  { %v1206_v48 = vpop.f32.mrb[13].mxu1 }
 0x3e7   :  { %v3560_v49 = vpop.f32.mrb[14].mxu1 }
 0x3e8   :  { %v1209_v50 = vpop.f32.mrb[15].mxu1 }
 0x3ec   :  { %v3449_v51 = vpop.f32.mrb[8].mxu0 }
 0x3ed   :  { %v3450_v52 = vpop.f32.mrb[9].mxu0 }
 0x3ee   :  { %v3451_v53 = vadd.f32 %v3450_v52, %v3449_v51  ;;  %v3452_v54 = vpop.f32.mrb[10].mxu0  ;;  %v1449_v52 = vld [vmem:[%s5781_s2 + $0x8] sm:$0xff] }
 0x3ef   :  { %v3453_v35 = vpop.f32.mrb[11].mxu0 }
 0x3f0   :  { %v1158_v55 = vadd.f32 %v3451_v53, %v1109_v29  ;;  %v3454_v56 = vadd.f32 %v3453_v35, %v3452_v54  ;;  %v1451_v53 = vld [vmem:[%s5781_s2 + $0x18] sm:$0xff]  ;;  %v1448_v54 = vld [vmem:[%s5781_s2] sm:$0xff] }
 0x3f1   :  { %v3671_v35 = vpack.c.bf16 %v1451_v53, %v1449_v52 }
 0x3f2   :  { %v1207_v57 = vadd.f32 %v1206_v48, %v1158_v55  ;;  %v1161_v58 = vadd.f32 %v3454_v56, %v1112_v34  ;;  %v1450_v55 = vld [vmem:[%s5781_s2 + $0x10] sm:$0xff]  ;;  %v1453_v56 = vld [vmem:[%s5781_s2 + $0x28] sm:$0xff] }
 0x3f4   :  { %v1210_v13 = vadd.f32 %v1209_v50, %v1161_v58  ;;  %v3455_v59 = vpop.f32.mrb[12].mxu0  ;;  %v1221_v63 = vmax.f32 %v1207_v57, 0.0  ;;  %v1455_v57 = vld [vmem:[%s5781_s2 + $0x38] sm:$0xff]  ;;  %v3673_v58 = vpack.c.bf16 %v1450_v55, %v1448_v54  ;;  %v1621_v55 = vld [vmem:[%s5782_s6 + $0x70] sm:$0xff] }
 0x3f5   :  { %v3456_v60 = vpop.f32.mrb[13].mxu0 }
 0x3f6   :  { %v1222_v24 = vmax.f32 %v1210_v13, 0.0  ;;  %v3457_v17 = vadd.f32 %v3456_v60, %v3455_v59  ;;  %v3458_v25 = vpop.f32.mrb[14].mxu0  ;;  %v1225_v9 = vsel %vm551_vm2, %v1221_v63, 0.0  ;;  %v3675_v13 = vpack.c.bf16 %v1455_v57, %v1453_v56  ;;  %v1452_v59 = vld [vmem:[%s5781_s2 + $0x20] sm:$0xff]  ;;  %v1454_v60 = vld [vmem:[%s5781_s2 + $0x30] sm:$0xff]  ;;  %v1624_v56 = vld [vmem:[%s5782_s6 + $0x88] sm:$0xff] }
 0x3f7   :  { %v3459_v62 = vpop.f32.mrb[15].mxu0  ;;  %v1626_v57 = vld [vmem:[%s5782_s6 + $0x98] sm:$0xff] }
 0x3f8   :  { %v1166_v1 = vadd.f32 %v3457_v17, %v1117_v44  ;;  %v3460_v61 = vadd.f32 %v3459_v62, %v3458_v25  ;;  %v1226_v5 = vsel %vm551_vm2, %v1222_v24, 0.0  ;;  %v1459_v17 = vld [vmem:[%s5781_s2 + $0x58] sm:$0xff]  ;;  %v3677_v25 = vpack.c.bf16 %v1454_v60, %v1452_v59  ;;  %v1623_v60 = vld [vmem:[%s5782_s6 + $0x80] sm:$0xff] }
 0x3f9   :  { %v1227_v15 = vadd.f32 %v1226_v5, %v1225_v9  ;;  %v1463_v5 = vld [vmem:[%s5781_s2 + $0x78] sm:$0xff]  ;;  %v1460_v9 = vld [vmem:[%s5781_s2 + $0x60] sm:$0xff]  ;;  %v4925_v59 = vpack.c.bf16 %v1626_v57, %v1624_v56  ;;  %v1657_v57 = vld [vmem:[%s5782_s6 + $0x190] sm:$0xff] }
 0x3fa   :  { %v1215_v6 = vadd.f32 %v3559_v47, %v1166_v1  ;;  %v1169_v8 = vadd.f32 %v3460_v61, %v1120_v46  ;;  %v1458_v1 = vld [vmem:[%s5781_s2 + $0x50] sm:$0xff]  ;;  %v1461_v61 = vld [vmem:[%s5781_s2 + $0x68] sm:$0xff]  ;;  %v1655_v56 = vld [vmem:[%s5782_s6 + $0x180] sm:$0xff] }
 0x3fc   :  { %v1223_v11 = vmax.f32 %v1215_v6, 0.0  ;;  %v1218_v14 = vadd.f32 %v3560_v49, %v1169_v8  ;;  %v3683_v8 = vpack.c.bf16 %v1463_v5, %v1461_v61  ;;  %v1629_v61 = vld [vmem:[%s5782_s6 + $0xb0] sm:$0xff]  ;;  %v1632_v5 = vld [vmem:[%s5782_s6 + $0xc8] sm:$0xff] }
 0x3fe   :  { %v1228_v16 = vsel %vm551_vm2, %v1223_v11, 0.0  ;;  %v1224_v18 = vmax.f32 %v1218_v14, 0.0 }
 0x3ff   :  { %v1229_v19 = vadd.f32 %v1228_v16, %v1227_v15  ;;  %v1608_v15 = vld [vmem:[%s5782_s6 + $0x8] sm:$0xff]  ;;  %v1610_v16 = vld [vmem:[%s5782_s6 + $0x18] sm:$0xff] }
 0x400   :  { %v1230_v20 = vsel %vm551_vm2, %v1224_v18, 0.0 }
 0x401   :  { %v1231_v33 = vadd.f32 %v1230_v20, %v1229_v19 }
 0x403   :  { %v1232_v21 = vrot.slane %v1231_v33, 4 }
 0x405   :  { %v1233_v22 = vadd.f32 %v1232_v21, %v1231_v33 }
 0x407   :  { %v1234_v23 = vrot.slane %v1233_v22, 2 }
 0x409   :  { %v1235_v26 = vadd.f32 %v1234_v23, %v1233_v22  ;;  %v3227_v23 = vld [vmem:[%s5783_s9] ss:$0 sm:$0xff] }
 0x40b   :  { %v1236_v27 = vrot.slane %v1235_v26, 1 }
 0x40d   :  { %v1237_v28 = vadd.f32 %v1236_v27, %v1235_v26 }
 0x40f   :  { %3578 = vmatmul.mubr.msk.f32.vlgmr.msra.gmra.mrb[16].mxu1 %vm551_vm2, %v1237_v28  ;;  %v1607_v28 = vld [vmem:[%s5782_s6] sm:$0xff] }
 0x410   :  { %3661 = vmatpush3.bf16.msra.mxu1 %v4715_v2  ;;  %3596 = vmatprep.mubr.msk.f32.mxu1 %vm4188_vm0, %v4189_v4 }
 0x411   :  { %3662 = vmatprep.subr.bf16.mxu1 %v4187_v0 }
 0x414   :  { %3664 = vmatpush3.bf16.msra.mxu1 %v4721_v3 }
 0x415   :  { %3665 = vmatprep.subr.bf16.mxu1 %v4187_v0 }
 0x418   :  { %3667 = vmatpush3.bf16.msra.mxu1 %v4731_v7 }
 0x419   :  { %3668 = vmatprep.subr.bf16.mxu1 %v4187_v0 }
 0x41c   :  { %3670 = vmatpush3.bf16.msra.mxu1 %v4741_v10 }
 0x41d   :  { %3672 = vmatprep.subr.bf16.mxu1 %v3671_v35  ;;  %v1619_v35 = vld [vmem:[%s5782_s6 + $0x60] sm:$0xff] }
 0x4e2   :  { %v1315_v29 = vpop.f32.mrb[16].mxu1 }
 0x4e3   :  { %v1322_v30 = vrot.slane %v1315_v29, %v4365_v41  ;;  %v3579_v12 = vpop.f32.mrb[17].mxu1  ;;  %v1609_v29 = vld [vmem:[%s5782_s6 + $0x10] sm:$0xff] }
 0x4e4   :  { %v1612_v12 = vld [vmem:[%s5782_s6 + $0x28] sm:$0xff] }
 0x4e5   :  { %v4761_v2 = vsub.f32 %v1221_v63, %v1322_v30  ;;  %v4763_v31 = vsub.f32 %v1222_v24, %v1322_v30  ;;  %v4765_v32 = vsub.f32 %v1223_v11, %v1322_v30  ;;  %v4767_v34 = vsub.f32 %v1224_v18, %v1322_v30  ;;  %v1457_v24 = vld [vmem:[%s5781_s2 + $0x48] sm:$0xff]  ;;  %v1456_v63 = vld [vmem:[%s5781_s2 + $0x40] sm:$0xff]  ;;  %v1462_v11 = vld [vmem:[%s5781_s2 + $0x70] sm:$0xff] }
 0x4e6   :  { %v3679_v62 = vpack.c.bf16 %v1459_v17, %v1457_v24  ;;  %v3681_v6 = vpack.c.bf16 %v1458_v1, %v1456_v63  ;;  %v3685_v14 = vpack.c.bf16 %v1462_v11, %v1460_v9  ;;  %v4837_v18 = vpack.c.bf16 %v1610_v16, %v1608_v15  ;;  %v3228_v30 = vld [vmem:[%s5784_s10] ss:$0 sm:$0xff]  ;;  %v1625_v24 = vld [vmem:[%s5782_s6 + $0x90] sm:$0xff]  ;;  %v1628_v17 = vld [vmem:[%s5782_s6 + $0xa8] sm:$0xff] }
 0x4e7   :  { %v1327_v3 = vmul.f32 %v4761_v2, %v4761_v2  ;;  %v1328_v0 = vmul.f32 %v4763_v31, %v4763_v31  ;;  %v1329_v7 = vmul.f32 %v4765_v32, %v4765_v32  ;;  %v1330_v10 = vmul.f32 %v4767_v34, %v4767_v34  ;;  %v1627_v1 = vld [vmem:[%s5782_s6 + $0xa0] sm:$0xff]  ;;  %v1636_v15 = vld [vmem:[%s5782_s6 + $0xe8] sm:$0xff]  ;;  %v1638_v16 = vld [vmem:[%s5782_s6 + $0xf8] sm:$0xff] }
 0x4e8   :  { %v1631_v11 = vld [vmem:[%s5782_s6 + $0xc0] sm:$0xff] }
 0x4e9   :  { %v1331_v36 = vsel %vm551_vm2, %v1327_v3, 0.0  ;;  %v1332_v37 = vsel %vm551_vm2, %v1328_v0, 0.0  ;;  %v1334_v38 = vsel %vm551_vm2, %v1329_v7, 0.0  ;;  %v1336_v44 = vsel %vm551_vm2, %v1330_v10, 0.0 }
 0x4ea   :  { %v1333_v43 = vadd.f32 %v1332_v37, %v1331_v36  ;;  %v4861_v3 = vpack.c.bf16 %v1609_v29, %v1607_v28  ;;  %v1611_v37 = vld [vmem:[%s5782_s6 + $0x20] sm:$0xff]  ;;  %v1641_v29 = vld [vmem:[%s5782_s6 + $0x110] sm:$0xff] }
 0x4eb   :  { %v1639_v28 = vld [vmem:[%s5782_s6 + $0x100] sm:$0xff] }
 0x4ec   :  { %v1335_v42 = vadd.f32 %v1334_v38, %v1333_v43  ;;  %v1613_v43 = vld [vmem:[%s5782_s6 + $0x30] sm:$0xff]  ;;  %v1616_v38 = vld [vmem:[%s5782_s6 + $0x48] sm:$0xff] }
 0x4ee   :  { %v1337_v45 = vadd.f32 %v1336_v44, %v1335_v42  ;;  %v1618_v42 = vld [vmem:[%s5782_s6 + $0x58] sm:$0xff] }
 0x4f0   :  { %v1338_v46 = vrot.slane %v1337_v45, 4 }
 0x4f2   :  { %v1339_v47 = vadd.f32 %v1338_v46, %v1337_v45 }
 0x4f4   :  { %v1340_v48 = vrot.slane %v1339_v47, 2 }
 0x4f6   :  { %v1341_v49 = vadd.f32 %v1340_v48, %v1339_v47  ;;  %v4885_v47 = vpack.c.bf16 %v1618_v42, %v1616_v38  ;;  %v1615_v48 = vld [vmem:[%s5782_s6 + $0x40] sm:$0xff] }
 0x4f7   :  { %v1647_v42 = vld [vmem:[%s5782_s6 + $0x140] sm:$0xff] }
 0x4f8   :  { %v1342_v50 = vrot.slane %v1341_v49, 1 }
 0x4fa   :  { %v1343_v51 = vadd.f32 %v1342_v50, %v1341_v49  ;;  %v1617_v49 = vld [vmem:[%s5782_s6 + $0x50] sm:$0xff]  ;;  %v1620_v50 = vld [vmem:[%s5782_s6 + $0x68] sm:$0xff] }
 0x4fc   :  { %3597 = vmatmul.mubr.msk.f32.vlgmr.msra.gmra.mrb[18].mxu1 %vm551_vm2, %v1343_v51  ;;  %v4902_v51 = vpack.c.bf16 %v1617_v49, %v1615_v48  ;;  %v1654_v48 = vld [vmem:[%s5782_s6 + $0x178] sm:$0xff]  ;;  %v1651_v49 = vld [vmem:[%s5782_s6 + $0x160] sm:$0xff] }
 0x4fd   :  { %1540 = vmatprep.mubr.f32.mxu1 %v4189_v4  ;;  %3674 = vmatpush1.bf16.msra.mxu1 %v3673_v58  ;;  %v4922_v58 = vpack.c.bf16 %v1621_v55, %v1619_v35 }
 0x4fe   :  { %3676 = vmatprep.subr.bf16.mxu1 %v3675_v13 }
 0x501   :  { %3678 = vmatpush1.bf16.msra.mxu1 %v3677_v25  ;;  %v1630_v25 = vld [vmem:[%s5782_s6 + $0xb8] sm:$0xff] }
 0x502   :  { %3680 = vmatprep.subr.bf16.mxu1 %v3679_v62  ;;  %v4941_v62 = vpack.c.bf16 %v1625_v24, %v1623_v60  ;;  %v4944_v63 = vpack.c.bf16 %v1630_v25, %v1628_v17  ;;  %v1662_v60 = vld [vmem:[%s5782_s6 + $0x1b8] sm:$0xff]  ;;  %v5085_v24 = vpack.c.bf16 %v1657_v57, %v1655_v56  ;;  %v1659_v25 = vld [vmem:[%s5782_s6 + $0x1a0] sm:$0xff] }
 0x505   :  { %3682 = vmatpush1.bf16.msra.mxu1 %v3681_v6  ;;  %v1634_v6 = vld [vmem:[%s5782_s6 + $0xd8] sm:$0xff] }
 0x506   :  { %3684 = vmatprep.subr.bf16.mxu1 %v3683_v8  ;;  %v4959_v8 = vpack.c.bf16 %v1629_v61, %v1627_v1  ;;  %v4962_v9 = vpack.c.bf16 %v1634_v6, %v1632_v5  ;;  %v1661_v1 = vld [vmem:[%s5782_s6 + $0x1b0] sm:$0xff]  ;;  %v1664_v61 = vld [vmem:[%s5782_s6 + $0x1c8] sm:$0xff]  ;;  %v1666_v5 = vld [vmem:[%s5782_s6 + $0x1d8] sm:$0xff] }
 0x507   :  { %v5103_v6 = vpack.c.bf16 %v1661_v1, %v1659_v25 }
 0x509   :  { %3686 = vmatpush1.bf16.msra.mxu1 %v3685_v14  ;;  %v1633_v14 = vld [vmem:[%s5782_s6 + $0xd0] sm:$0xff] }
 0x50a   :  { %3688 = vmatprep.subr.bf16.mxu1 %v4837_v18 }
 0x5cf   :  { %v1413_v19 = vpop.f32.mrb[18].mxu1 }
 0x5d0   :  { %v1414_v20 = vadd.f32 1e-05, %v1413_v19  ;;  %v3598_v33 = vpop.f32.mrb[19].mxu1  ;;  %v4977_v19 = vpack.c.bf16 %v1633_v14, %v1631_v11  ;;  %v5106_v11 = vpack.c.bf16 %v1666_v5, %v1664_v61  ;;  %v1663_v14 = vld [vmem:[%s5782_s6 + $0x1c0] sm:$0xff] }
 0x5d1   :  { %v1635_v33 = vld [vmem:[%s5782_s6 + $0xe0] sm:$0xff] }
 0x5d2   :  { %4181 = vrsqrt.f32 %v1414_v20  ;;  %v4980_v20 = vpack.c.bf16 %v1638_v16, %v1636_v15  ;;  %v1665_v15 = vld [vmem:[%s5782_s6 + $0x1d0] sm:$0xff]  ;;  %v1668_v16 = vld [vmem:[%s5782_s6 + $0x1e8] sm:$0xff] }
 0x5dc   :  { %v4182_v21 = vpop.eup %4181 }
 0x5dd   :  { %v1421_v22 = vrot.slane %v4182_v21, %v4365_v41  ;;  %v1637_v21 = vld [vmem:[%s5782_s6 + $0xf0] sm:$0xff] }
 0x5df   :  { %v1422_v26 = vmul.f32 %v1421_v22, %v4761_v2  ;;  %v1423_v27 = vmul.f32 %v1421_v22, %v4763_v31  ;;  %v1614_v2 = vld [vmem:[%s5782_s6 + $0x38] sm:$0xff]  ;;  %v1424_v10 = vmul.f32 %v1421_v22, %v4765_v32  ;;  %v4881_v32 = vpack.c.bf16 %v1613_v43, %v1611_v37  ;;  %v1648_v37 = vld [vmem:[%s5782_s6 + $0x148] sm:$0xff] }
 0x5e0   :  { %v4864_v36 = vpack.c.bf16 %v1614_v2, %v1612_v12  ;;  %v1425_v46 = vmul.f32 %v1421_v22, %v4767_v34  ;;  %v1622_v34 = vld [vmem:[%s5782_s6 + $0x78] sm:$0xff]  ;;  %v4989_v22 = vpack.c.bf16 %v1637_v21, %v1635_v33  ;;  %v1644_v12 = vld [vmem:[%s5782_s6 + $0x128] sm:$0xff]  ;;  %v5121_v21 = vpack.c.bf16 %v1665_v15, %v1663_v14 }
 0x5e1   :  { %v1433_v31 = vmul.f32 %v3227_v23, %v1422_v26  ;;  %v1434_v7 = vmul.f32 %v3227_v23, %v1423_v27  ;;  %v1435_v45 = vmul.f32 %v3227_v23, %v1424_v10  ;;  %v4905_v54 = vpack.c.bf16 %v1622_v34, %v1620_v50  ;;  %v1642_v26 = vld [vmem:[%s5782_s6 + $0x118] sm:$0xff]  ;;  %v1653_v34 = vld [vmem:[%s5782_s6 + $0x170] sm:$0xff] }
 0x5e2   :  { %v1436_v53 = vmul.f32 %v3227_v23, %v1425_v46  ;;  %v1640_v23 = vld [vmem:[%s5782_s6 + $0x108] sm:$0xff]  ;;  %v1646_v2 = vld [vmem:[%s5782_s6 + $0x138] sm:$0xff]  ;;  %v5067_v35 = vpack.c.bf16 %v1653_v34, %v1651_v49 }
 0x5e3   :  { %v1444_v0 = vadd.f32 %v3228_v30, %v1433_v31  ;;  %v1445_v44 = vadd.f32 %v3228_v30, %v1434_v7  ;;  %v1446_v52 = vadd.f32 %v3228_v30, %v1435_v45  ;;  %v4999_v27 = vpack.c.bf16 %v1642_v26, %v1640_v23  ;;  %v1645_v7 = vld [vmem:[%s5782_s6 + $0x130] sm:$0xff]  ;;  %v1650_v43 = vld [vmem:[%s5782_s6 + $0x158] sm:$0xff]  ;;  %v1652_v46 = vld [vmem:[%s5782_s6 + $0x168] sm:$0xff] }
 0x5e4   :  { %v1447_v13 = vadd.f32 %v3228_v30, %v1436_v53  ;;  %v5007_v30 = vpack.c.bf16 %v1641_v29, %v1639_v28  ;;  %v5017_v31 = vpack.c.bf16 %v1646_v2, %v1644_v12  ;;  %v5035_v38 = vpack.c.bf16 %v1650_v43, %v1648_v37  ;;  %v1658_v53 = vld [vmem:[%s5782_s6 + $0x198] sm:$0xff]  ;;  %v1667_v26 = vld [vmem:[%s5782_s6 + $0x1e0] sm:$0xff]  ;;  %v1669_v28 = vld [vmem:[%s5782_s6 + $0x1f0] sm:$0xff] }
 0x5e5   :  { %3229 = vmatmul.mubr.msk.f32.vlgmr.msra.gmra.mrb[20].mxu1 %vm551_vm2, %v1444_v0  ;;  %v1643_v0 = vld [vmem:[%s5782_s6 + $0x120] sm:$0xff]  ;;  %v5056_v50 = vpack.c.bf16 %v1654_v48, %v1652_v46  ;;  %v1670_v33 = vld [vmem:[%s5782_s6 + $0x1f8] sm:$0xff]  ;;  %v5133_v29 = vpack.c.bf16 %v1669_v28, %v1667_v26 }
 0x5e6   :  { %1546 = vmatprep.mubr.f32.mxu1 %v4189_v4  ;;  %3690 = vmatpush1.bf16.msra.mxu1 %v4861_v3  ;;  %v5025_v10 = vpack.c.bf16 %v1645_v7, %v1643_v0  ;;  %v5124_v23 = vpack.c.bf16 %v1670_v33, %v1668_v16 }
 0x5e7   :  { %3692 = vmatprep.subr.bf16.mxu1 %v4864_v36 }
 0x5e9   :  { %3230 = vmatmul.mubr.msk.f32.gmra.mrb[22].mxu1 %vm551_vm2, %v1445_v44  ;;  %v1649_v44 = vld [vmem:[%s5782_s6 + $0x150] sm:$0xff] }
 0x5ea   :  { %1552 = vmatprep.mubr.f32.mxu1 %v4189_v4  ;;  %3694 = vmatpush1.bf16.msra.mxu1 %v4881_v32  ;;  %v5043_v45 = vpack.c.bf16 %v1649_v44, %v1647_v42 }
 0x5eb   :  { %3696 = vmatprep.subr.bf16.mxu1 %v4885_v47 }
 0x5ed   :  { %3231 = vmatmul.mubr.msk.f32.gmra.mrb[24].mxu1 %vm551_vm2, %v1446_v52  ;;  %v1656_v52 = vld [vmem:[%s5782_s6 + $0x188] sm:$0xff] }
 0x5ee   :  { %1558 = vmatprep.mubr.f32.mxu1 %v4189_v4  ;;  %3698 = vmatpush1.bf16.msra.mxu1 %v4902_v51  ;;  %v5069_v55 = vpack.c.bf16 %v1658_v53, %v1656_v52 }
 0x5ef   :  { %3700 = vmatprep.subr.bf16.mxu1 %v4905_v54 }
 0x5f1   :  { %3232 = vmatmul.mubr.msk.f32.gmra.mrb[26].mxu1 %vm551_vm2, %v1447_v13  ;;  %v1660_v13 = vld [vmem:[%s5782_s6 + $0x1a8] sm:$0xff] }
 0x5f2   :  { %3702 = vmatpush1.bf16.msra.mxu1 %v4922_v58  ;;  %v5088_v17 = vpack.c.bf16 %v1662_v60, %v1660_v13 }
 0x5f3   :  { %3704 = vmatprep.subr.bf16.mxu1 %v4925_v59 }
 0x5f6   :  { %3706 = vmatpush1.bf16.msra.mxu1 %v4941_v62 }
 0x5f7   :  { %3708 = vmatprep.subr.bf16.mxu1 %v4944_v63 }
 0x5fa   :  { %3710 = vmatpush1.bf16.msra.mxu1 %v4959_v8 }
 0x5fb   :  { %3712 = vmatprep.subr.bf16.mxu1 %v4962_v9 }
 0x5fe   :  { %3714 = vmatpush1.bf16.msra.mxu1 %v4977_v19 }
 0x5ff   :  { %3716 = vmatprep.subr.bf16.mxu1 %v4980_v20 }
 0x602   :  { %3718 = vmatpush1.bf16.msra.mxu1 %v4989_v22 }
 0x603   :  { %3720 = vmatprep.subr.bf16.mxu1 %v4999_v27 }
 0x606   :  { %3722 = vmatpush1.bf16.msra.mxu1 %v5007_v30 }
 0x607   :  { %3724 = vmatprep.subr.bf16.mxu1 %v5017_v31 }
 0x60a   :  { %3726 = vmatpush1.bf16.msra.mxu1 %v5025_v10 }
 0x60b   :  { %3728 = vmatprep.subr.bf16.mxu1 %v5035_v38 }
 0x60e   :  { %3730 = vmatpush1.bf16.msra.mxu1 %v5043_v45 }
 0x60f   :  { %3732 = vmatprep.subr.bf16.mxu1 %v5056_v50 }
 0x612   :  { %3734 = vmatpush1.bf16.msra.mxu1 %v5067_v35 }
 0x613   :  { %3736 = vmatprep.subr.bf16.mxu1 %v5069_v55 }
 0x616   :  { %3738 = vmatpush1.bf16.msra.mxu1 %v5085_v24 }
 0x617   :  { %3740 = vmatprep.subr.bf16.mxu1 %v5088_v17 }
 0x61a   :  { %3742 = vmatpush1.bf16.msra.mxu1 %v5103_v6 }
 0x61b   :  { %3744 = vmatprep.subr.bf16.mxu1 %v5106_v11 }
 0x61e   :  { %3746 = vmatpush1.bf16.msra.mxu1 %v5121_v21 }
 0x61f   :  { %3748 = vmatprep.subr.bf16.mxu1 %v5124_v23 }
 0x622   :  { %3750 = vmatpush1.bf16.msra.mxu1 %v5133_v29 }
 0x623   :  { %3752 = vmatprep.subr.bf16.mxu1 %v4837_v18 }
 0x6b8   :  { %v1542_v12 = vpop.f32.mrb[20].mxu1 }
 0x6b9   :  { %v1544_v2 = vpop.f32.mrb[21].mxu1  ;;  %v1573_v42 = vmul.f32 0.2, %v1542_v12  ;;  %vm1565_vm7 = vcmp.gt.f32.partialorder %v1542_v12, 0.0 }
 0x6ba   :  { %v1574_v44 = vmul.f32 0.2, %v1544_v2  ;;  %vm1566_vm8 = vcmp.gt.f32.partialorder %v1544_v2, 0.0 }
 0x6bb   :  { %v5142_v53 = vsel %vm1565_vm7, %v1542_v12, %v1573_v42  ;;  %vm1931_vm7 = vcmask 122880  }
 0x6bc   :  { %v1548_v0 = vpop.f32.mrb[22].mxu1  ;;  %v5146_v57 = vsel %vm1566_vm8, %v1544_v2, %v1574_v44  ;;  %1932 = vst.msk [vmem:[#allocation3 + $0x30] sm:$0x1] %vm1931_vm7, %v4189_v4  ;;  %1935 = vst.msk [vmem:[#allocation3 + $0x78] sm:$0x1] %vm1931_vm7, %v4189_v4  ;;  %vm1939_vm8 = vcmask 254080  }
 0x6bd   :  { %v1575_v7 = vmul.f32 0.2, %v1548_v0  ;;  %v1550_v37 = vpop.f32.mrb[23].mxu1  ;;  %vm1567_vm0 = vcmp.gt.f32.partialorder %v1548_v0, 0.0  ;;  %1940 = vst.msk [vmem:[#allocation3 + $0x40] sm:$0x1] %vm1939_vm8, %v4189_v4 }
 0x6be   :  { %v1576_v43 = vmul.f32 0.2, %v1550_v37  ;;  %vm1568_vm5 = vcmp.gt.f32.partialorder %v1550_v37, 0.0  ;;  %1943 = vst.msk [vmem:[#allocation3 + $0x88] sm:$0x1] %vm1939_vm8, %v4189_v4 }
 0x6bf   :  { %v5138_v48 = vsel %vm1567_vm0, %v1548_v0, %v1575_v7  ;;  %vm1936_vm0 = vcmask 261249  }
 0x6c0   :  { %v1554_v46 = vpop.f32.mrb[24].mxu1  ;;  %v5140_v52 = vsel %vm1568_vm5, %v1550_v37, %v1576_v43  ;;  %v1589_v13 = vadd.f32 %v5138_v48, %v5142_v53  ;;  %1937 = vst.msk [vmem:[#allocation3 + $0x10] sm:$0xfe] %vm1936_vm0, %v4189_v4  ;;  %1941 = vst.msk [vmem:[#allocation3 + $0x58] sm:$0xfe] %vm1936_vm0, %v4189_v4  ;;  %vm1952_vm5 = vcmask 1040384  }
 0x6c1   :  { %vm1569_vm9 = vcmp.gt.f32.partialorder %v1554_v46, 0.0  ;;  %v1577_v49 = vmul.f32 0.2, %v1554_v46  ;;  %v1556_v34 = vpop.f32.mrb[25].mxu1  ;;  %v1598_v1 = vadd.f32 %v5140_v52, %v5146_v57 }
 0x6c2   :  { %vm1570_vm10 = vcmp.gt.f32.partialorder %v1556_v34, 0.0  ;;  %v1578_v18 = vmul.f32 0.2, %v1556_v34 }
 0x6c3   :  { %v5144_v56 = vsel %vm1569_vm9, %v1554_v46, %v1577_v49  ;;  %vm1915_vm9 = vcmp.lt.s32.totalorder %v144_v39, 288 }
 0x6c4   :  { %v5150_v60 = vsel %vm1570_vm10, %v1556_v34, %v1578_v18  ;;  %v1560_v25 = vpop.f32.mrb[26].mxu1  ;;  %v1590_v14 = vadd.f32 %v1589_v13, %v5144_v56  ;;  %1917 = vst.msk [vmem:[#allocation3] ss:$8 sm:$0x7] %vm1915_vm9, %v4189_v4  ;;  %vm2013_vm10 = vcmask 1047681  }
 0x6c5   :  { %vm1571_vm11 = vcmp.gt.f32.partialorder %v1560_v25, 0.0  ;;  %v1579_v61 = vmul.f32 0.2, %v1560_v25  ;;  %v1562_v5 = vpop.f32.mrb[27].mxu1  ;;  %v1599_v16 = vadd.f32 %v1598_v1, %v5150_v60  ;;  %v4017_v1 = vld [vmem:[%s5785_s3] ss:$8 sps:$4 sm:$0xff]  }
 0x6c6   :  { %vm1572_vm15 = vcmp.gt.f32.partialorder %v1562_v5, 0.0  ;;  %v1580_v15 = vmul.f32 0.2, %v1562_v5  ;;  %1920 = vst.msk [vmem:[#allocation3 + $0x48] ss:$8 sm:$0x7] %vm1915_vm9, %v4189_v4 }
 0x6c7   :  { %v1587_v33 = vsel %vm1571_vm11, %v1560_v25, %v1579_v61  ;;  %v4019_v61 = vld [vmem:[%s5785_s3 + $0x4] ss:$8 sps:$4 sm:$0xff]   ;;  %1923 = vst.msk [vmem:[#allocation3 + $0x31] ss:$8 sm:$0x7] %vm1915_vm9, %v4189_v4  ;;  %vm2020_vm11 = vcmask 1040512  }
 0x6c8   :  { %v1591_v26 = vadd.f32 %v1590_v14, %v1587_v33  ;;  %v1588_v28 = vsel %vm1572_vm15, %v1562_v5, %v1580_v15  ;;  %v4022_v5 = vld [vmem:[%s5785_s3 + $0x14] ss:$8 sps:$4 sm:$0xff]   ;;  %2923 = vmatprep.subr.bf16.mxu0 %v4019_v61  ;;  %v4020_v14 = vld [vmem:[%s5785_s3 + $0x10] ss:$8 sps:$4 sm:$0xff]   ;;  %v4025_v15 = vld [vmem:[%s5785_s3 + $0x24] ss:$8 sps:$4 sm:$0xff]  }
 0x6c9   :  { %v1600_v12 = vadd.f32 %v1599_v16, %v1588_v28  ;;  %2924 = vmatpush1.bf16.msra.mxu0 %v4017_v1  ;;  %v4023_v16 = vld [vmem:[%s5785_s3 + $0x20] ss:$8 sps:$4 sm:$0xff]   ;;  %1926 = vst.msk [vmem:[#allocation3 + $0x79] ss:$8 sm:$0x7] %vm1915_vm9, %v4189_v4 }
 0x6ca   :  { %v1592_v2 = vrot.slane %v1591_v26, 4  ;;  %2925 = vmatprep.subr.bf16.mxu0 %v4022_v5 }
 0x6cb   :  { %v1601_v0 = vrot.slane %v1600_v12, 4 }
 0x6cc   :  { %v1593_v7 = vadd.f32 %v1592_v2, %v1591_v26  ;;  %v4026_v26 = vld [vmem:[%s5785_s3 + $0x30] ss:$8 sps:$4 sm:$0xff]   ;;  %v4034_v2 = vld [vmem:[%s5785_s3 + $0x54] ss:$8 sps:$4 sm:$0xff]  }
 0x6cd   :  { %v1602_v37 = vadd.f32 %v1601_v0, %v1600_v12  ;;  %2926 = vmatpush1.bf16.msra.mxu0 %v4020_v14  ;;  %v4029_v12 = vld [vmem:[%s5785_s3 + $0x40] ss:$8 sps:$4 sm:$0xff]   ;;  %v4032_v0 = vld [vmem:[%s5785_s3 + $0x50] ss:$8 sps:$4 sm:$0xff]  }
 0x6ce   :  { %v1594_v43 = vrot.slane %v1593_v7, 2  ;;  %2927 = vmatprep.subr.bf16.mxu0 %v4025_v15 }
 0x6cf   :  { %v1603_v42 = vrot.slane %v1602_v37, 2 }
 0x6d0   :  { %v1595_v44 = vadd.f32 %v1594_v43, %v1593_v7  ;;  %v4037_v7 = vld [vmem:[%s5785_s3 + $0x64] ss:$8 sps:$4 sm:$0xff]   ;;  %v4040_v43 = vld [vmem:[%s5785_s3 + $0x74] ss:$8 sps:$4 sm:$0xff]  }
 0x6d1   :  { %v1604_v46 = vadd.f32 %v1603_v42, %v1602_v37  ;;  %2928 = vmatpush1.bf16.msra.mxu0 %v4023_v16  ;;  %v4035_v37 = vld [vmem:[%s5785_s3 + $0x60] ss:$8 sps:$4 sm:$0xff]   ;;  %v4038_v42 = vld [vmem:[%s5785_s3 + $0x70] ss:$8 sps:$4 sm:$0xff]  }
 0x6d2   :  { %v1596_v49 = vrot.slane %v1595_v44, 1 }
 0x6d3   :  { %v1605_v34 = vrot.slane %v1604_v46, 1 }
 0x6d4   :  { %v1597_v13 = vadd.f32 %v1596_v49, %v1595_v44  ;;  %v4043_v44 = vld [vmem:[%s5785_s3 + $0x84] ss:$8 sps:$4 sm:$0xff]   ;;  %v4046_v49 = vld [vmem:[%s5785_s3 + $0x94] ss:$8 sps:$4 sm:$0xff]  }
 0x6d5   :  { %v1606_v18 = vadd.f32 %v1605_v34, %v1604_v46  ;;  %v4041_v46 = vld [vmem:[%s5785_s3 + $0x80] ss:$8 sps:$4 sm:$0xff]   ;;  %v4044_v34 = vld [vmem:[%s5785_s3 + $0x90] ss:$8 sps:$4 sm:$0xff]  }
 0x6d7   :  { %1735 = vmatprep.mubr.f32.mxu1 %v1606_v18  ;;  %v4049_v18 = vld [vmem:[%s5785_s3 + $0xa4] ss:$8 sps:$4 sm:$0xff]  }
 0x6d8   :  { %1736 = vmatmul.mubr.f32.vlgmr.msra.gmra.mrb[28].mxu1 %v1597_v13  ;;  %v4047_v13 = vld [vmem:[%s5785_s3 + $0xa0] ss:$8 sps:$4 sm:$0xff]  }
 0x6d9   :  { %3754 = vmatpush1.bf16.msra.mxu1 %v4861_v3 }
 0x6da   :  { %3756 = vmatprep.subr.bf16.mxu1 %v4864_v36 }
 0x6dd   :  { %3758 = vmatpush1.bf16.msra.mxu1 %v4881_v32 }
 0x6de   :  { %3760 = vmatprep.subr.bf16.mxu1 %v4885_v47 }
 0x6e1   :  { %3762 = vmatpush1.bf16.msra.mxu1 %v4902_v51 }
 0x6e2   :  { %3764 = vmatprep.subr.bf16.mxu1 %v4905_v54 }
 0x6e5   :  { %3766 = vmatpush1.bf16.msra.mxu1 %v4922_v58 }
 0x6e6   :  { %3768 = vmatprep.subr.bf16.mxu1 %v4925_v59 }
 0x6e9   :  { %3770 = vmatpush1.bf16.msra.mxu1 %v4941_v62 }
 0x6ea   :  { %3772 = vmatprep.subr.bf16.mxu1 %v4944_v63 }
 0x6ed   :  { %3774 = vmatpush1.bf16.msra.mxu1 %v4959_v8 }
 0x6ee   :  { %3776 = vmatprep.subr.bf16.mxu1 %v4962_v9 }
 0x6f1   :  { %3778 = vmatpush1.bf16.msra.mxu1 %v4977_v19 }
 0x6f2   :  { %3780 = vmatprep.subr.bf16.mxu1 %v4980_v20 }
 0x6f5   :  { %3782 = vmatpush1.bf16.msra.mxu1 %v4989_v22 }
 0x6f6   :  { %3784 = vmatprep.subr.bf16.mxu1 %v4999_v27 }
 0x6f9   :  { %3786 = vmatpush1.bf16.msra.mxu1 %v5007_v30 }
 0x6fa   :  { %3788 = vmatprep.subr.bf16.mxu1 %v5017_v31 }
 0x6fd   :  { %3790 = vmatpush1.bf16.msra.mxu1 %v5025_v10 }
 0x6fe   :  { %3792 = vmatprep.subr.bf16.mxu1 %v5035_v38 }
 0x701   :  { %3794 = vmatpush1.bf16.msra.mxu1 %v5043_v45 }
 0x702   :  { %3796 = vmatprep.subr.bf16.mxu1 %v5056_v50 }
 0x705   :  { %3798 = vmatpush1.bf16.msra.mxu1 %v5067_v35 }
 0x706   :  { %3800 = vmatprep.subr.bf16.mxu1 %v5069_v55 }
 0x709   :  { %3802 = vmatpush1.bf16.msra.mxu1 %v5085_v24 }
 0x70a   :  { %3804 = vmatprep.subr.bf16.mxu1 %v5088_v17 }
 0x70d   :  { %3806 = vmatpush1.bf16.msra.mxu1 %v5103_v6 }
 0x70e   :  { %3808 = vmatprep.subr.bf16.mxu1 %v5106_v11 }
 0x711   :  { %3810 = vmatpush1.bf16.msra.mxu1 %v5121_v21 }
 0x712   :  { %3812 = vmatprep.subr.bf16.mxu1 %v5124_v23 }
 0x715   :  { %3814 = vmatpush1.bf16.msra.mxu1 %v5133_v29 }
 0x7ab   :  { %v1737_v3 = vpop.f32.mrb[28].mxu1 }
 0x7ac   :  { %v1745_v36 = vrot.slane %v1737_v3, %v4365_v41  ;;  %v1739_v32 = vpop.f32.mrb[29].mxu1  ;;  %v4052_v3 = vld [vmem:[%s5785_s3 + $0xb4] ss:$8 sps:$4 sm:$0xff]  }
 0x7ad   :  { %v1749_v47 = vrot.slane %v1739_v32, %v4365_v41 }
 0x7ae   :  { %v5190_v51 = vsub.f32 %v5142_v53, %v1745_v36  ;;  %v5193_v54 = vsub.f32 %v5138_v48, %v1745_v36  ;;  %v5196_v58 = vsub.f32 %v5144_v56, %v1745_v36  ;;  %v5207_v8 = vsub.f32 %v1587_v33, %v1745_v36  ;;  %v4028_v33 = vld [vmem:[%s5785_s3 + $0x34] ss:$8 sps:$4 sm:$0xff]   ;;  %v4050_v36 = vld [vmem:[%s5785_s3 + $0xb0] ss:$8 sps:$4 sm:$0xff]  }
 0x7af   :  { %v5199_v59 = vsub.f32 %v5146_v57, %v1749_v47  ;;  %v5202_v62 = vsub.f32 %v5140_v52, %v1749_v47  ;;  %v5205_v63 = vsub.f32 %v5150_v60, %v1749_v47  ;;  %v5213_v20 = vsub.f32 %v1588_v28, %v1749_v47  ;;  %2929 = vmatprep.subr.bf16.mxu0 %v4028_v33  ;;  %v4031_v28 = vld [vmem:[%s5785_s3 + $0x44] ss:$8 sps:$4 sm:$0xff]  }
 0x7b0   :  { %v1758_v9 = vmul.f32 %v5190_v51, %v5190_v51  ;;  %v1760_v19 = vmul.f32 %v5193_v54, %v5193_v54  ;;  %v1762_v30 = vmul.f32 %v5196_v58, %v5196_v58  ;;  %v1764_v45 = vmul.f32 %v5207_v8, %v5207_v8  ;;  %2930 = vmatpush1.bf16.msra.mxu0 %v4026_v26 }
 0x7b1   :  { %v1759_v22 = vmul.f32 %v5199_v59, %v5199_v59  ;;  %v1761_v27 = vmul.f32 %v5202_v62, %v5202_v62  ;;  %v1763_v10 = vmul.f32 %v5205_v63, %v5205_v63  ;;  %v1765_v35 = vmul.f32 %v5213_v20, %v5213_v20  ;;  %2931 = vmatprep.subr.bf16.mxu0 %v4031_v28 }
 0x7b2   :  { %v1766_v31 = vadd.f32 %v1760_v19, %v1758_v9 }
 0x7b3   :  { %v1775_v38 = vadd.f32 %v1761_v27, %v1759_v22  ;;  %v1873_v22 = vld [vmem:[%s5786_s11] sm:$0x3]  ;;  %v1881_v27 = vsub.s32 1, %v4362_v40 }
 0x7b4   :  { %v1767_v50 = vadd.f32 %v1766_v31, %v1762_v30  ;;  %2932 = vmatpush1.bf16.msra.mxu0 %v4029_v12  ;;  %v1893_v31 = vld [vmem:[%s5787_s12] sm:$0x3] }
 0x7b5   :  { %v1776_v55 = vadd.f32 %v1775_v38, %v1763_v10  ;;  %2933 = vmatprep.subr.bf16.mxu0 %v4034_v2  ;;  %v4053_v10 = vld [vmem:[%s5785_s3 + $0xc0] ss:$8 sps:$4 sm:$0xff]   ;;  %v4055_v38 = vld [vmem:[%s5785_s3 + $0xc4] ss:$8 sps:$4 sm:$0xff]  }
 0x7b6   :  { %v1768_v24 = vadd.f32 %v1767_v50, %v1764_v45  ;;  %v1878_v50 = vrot.slane %v1873_v22, %v4365_v41 }
 0x7b7   :  { %v1777_v17 = vadd.f32 %v1776_v55, %v1765_v35  ;;  %v1882_v55 = vrot.slane %v1873_v22, %v1881_v27 }
 0x7b8   :  { %v1769_v6 = vrot.slane %v1768_v24, 4  ;;  %2934 = vmatpush1.bf16.msra.mxu0 %v4032_v0 }
 0x7b9   :  { %v1778_v11 = vrot.slane %v1777_v17, 4  ;;  %2935 = vmatprep.subr.bf16.mxu0 %v4037_v7 }
 0x7ba   :  { %v1770_v21 = vadd.f32 %v1769_v6, %v1768_v24 }
 0x7bb   :  { %v1779_v23 = vadd.f32 %v1778_v11, %v1777_v17  ;;  %v1898_v17 = vrot.slane %v1893_v31, %v4365_v41 }
 0x7bc   :  { %v1771_v29 = vrot.slane %v1770_v21, 2  ;;  %2936 = vmatpush1.bf16.msra.mxu0 %v4035_v37 }
 0x7bd   :  { %v1780_v48 = vrot.slane %v1779_v23, 2  ;;  %2937 = vmatprep.subr.bf16.mxu0 %v4040_v43 }
 0x7be   :  { %v1772_v52 = vadd.f32 %v1771_v29, %v1770_v21  ;;  %v1902_v21 = vrot.slane %v1893_v31, %v1881_v27  ;;  %v4056_v29 = vld [vmem:[%s5785_s3 + $0xd0] ss:$8 sps:$4 sm:$0xff]  }
 0x7bf   :  { %v1781_v53 = vadd.f32 %v1780_v48, %v1779_v23  ;;  %v4058_v48 = vld [vmem:[%s5785_s3 + $0xd4] ss:$8 sps:$4 sm:$0xff]  }
 0x7c0   :  { %v1773_v56 = vrot.slane %v1772_v52, 1  ;;  %2938 = vmatpush1.bf16.msra.mxu0 %v4038_v42 }
 0x7c1   :  { %v1782_v57 = vrot.slane %v1781_v53, 1  ;;  %2939 = vmatprep.subr.bf16.mxu0 %v4043_v44 }
 0x7c2   :  { %v1774_v25 = vadd.f32 %v1773_v56, %v1772_v52 }
 0x7c3   :  { %v1783_v60 = vadd.f32 %v1782_v57, %v1781_v53 }
 0x7c4   :  { %2940 = vmatpush1.bf16.msra.mxu0 %v4041_v46 }
 0x7c5   :  { %1848 = vmatprep.mubr.f32.mxu1 %v1783_v60  ;;  %2941 = vmatprep.subr.bf16.mxu0 %v4046_v49  ;;  %v4061_v60 = vld [vmem:[%s5785_s3 + $0xe4] ss:$8 sps:$4 sm:$0xff]  }
 0x7c6   :  { %1849 = vmatmul.mubr.f32.vlgmr.msra.gmra.mrb[30].mxu1 %v1774_v25 }
 0x7c8   :  { %2942 = vmatpush1.bf16.msra.mxu0 %v4044_v34  ;;  %v4067_v34 = vld [vmem:[%s5785_s3 + $0x104] ss:$8 sps:$4 sm:$0xff]  }
 0x7c9   :  { %2943 = vmatprep.subr.bf16.mxu0 %v4049_v18 }
 0x7cc   :  { %2944 = vmatpush1.bf16.msra.mxu0 %v4047_v13 }
 0x7cd   :  { %2945 = vmatprep.subr.bf16.mxu0 %v4052_v3 }
 0x7d0   :  { %2946 = vmatpush1.bf16.msra.mxu0 %v4050_v36 }
 0x7d1   :  { %2947 = vmatprep.subr.bf16.mxu0 %v4055_v38 }
 0x7d4   :  { %2948 = vmatpush1.bf16.msra.mxu0 %v4053_v10 }
 0x7d5   :  { %2949 = vmatprep.subr.bf16.mxu0 %v4058_v48 }
 0x7d8   :  { %2950 = vmatpush1.bf16.msra.mxu0 %v4056_v29 }
 0x7d9   :  { %2951 = vmatprep.subr.bf16.mxu0 %v4061_v60 }
 0x899   :  { %v1850_v32 = vpop.f32.mrb[30].mxu1 }
 0x89a   :  { %v1851_v47 = vadd.f32 1e-05, %v1850_v32  ;;  %v1852_v9 = vpop.f32.mrb[31].mxu1 }
 0x89b   :  { %v1853_v19 = vadd.f32 1e-05, %v1852_v9 }
 0x89c   :  { %4183 = vrsqrt.f32 %v1851_v47 }
 0x89d   :  { %4185 = vrsqrt.f32 %v1853_v19 }
 0x8a6   :  { %v4184_v30 = vpop.eup %4183 }
 0x8a7   :  { %v4186_v45 = vpop.eup %4185  ;;  %v1860_v40 = vrot.slane %v4184_v30, %v4365_v41 }
 0x8a8   :  { %v1864_v35 = vrot.slane %v4186_v45, %v4365_v41 }
 0x8a9   :  { %v1865_v24 = vmul.f32 %v1860_v40, %v5190_v51  ;;  %v1867_v6 = vmul.f32 %v1860_v40, %v5193_v54  ;;  %v1869_v1 = vmul.f32 %v1860_v40, %v5196_v58  ;;  %v1871_v15 = vmul.f32 %v1860_v40, %v5207_v8  ;;  %v4062_v58 = vld [vmem:[%s5785_s3 + $0xf0] ss:$8 sps:$4 sm:$0xff]  }
 0x8aa   :  { %v1866_v11 = vmul.f32 %v1864_v35, %v5199_v59  ;;  %v1868_v23 = vmul.f32 %v1864_v35, %v5202_v62  ;;  %v4059_v62 = vld [vmem:[%s5785_s3 + $0xe0] ss:$8 sps:$4 sm:$0xff]   ;;  %v1870_v14 = vmul.f32 %v1864_v35, %v5205_v63  ;;  %v1872_v33 = vmul.f32 %v1864_v35, %v5213_v20  ;;  %v4064_v63 = vld [vmem:[%s5785_s3 + $0xf4] ss:$8 sps:$4 sm:$0xff]  }
 0x8ab   :  { %v1885_v52 = vmul.f32 %v1878_v50, %v1865_v24  ;;  %v1887_v51 = vmul.f32 %v1878_v50, %v1867_v6  ;;  %2952 = vmatpush1.bf16.msra.mxu0 %v4059_v62  ;;  %v1889_v8 = vmul.f32 %v1878_v50, %v1869_v1  ;;  %v1891_v28 = vmul.f32 %v1878_v50, %v1871_v15  ;;  %v4065_v35 = vld [vmem:[%s5785_s3 + $0x100] ss:$8 sps:$4 sm:$0xff]  }
 0x8ac   :  { %v1886_v53 = vmul.f32 %v1882_v55, %v1866_v11  ;;  %v1888_v41 = vmul.f32 %v1882_v55, %v1868_v23  ;;  %v1890_v26 = vmul.f32 %v1882_v55, %v1870_v14  ;;  %2953 = vmatprep.subr.bf16.mxu0 %v4064_v63  ;;  %v1892_v2 = vmul.f32 %v1882_v55, %v1872_v33  ;;  %v4071_v1 = vld [vmem:[%s5785_s3 + $0x120] ss:$8 sps:$4 sm:$0xff]  }
 0x8ad   :  { %v1905_v54 = vadd.f32 %v1898_v17, %v1885_v52  ;;  %v1907_v56 = vadd.f32 %v1898_v17, %v1887_v51  ;;  %v1909_v0 = vadd.f32 %v1898_v17, %v1889_v8  ;;  %v1911_v37 = vadd.f32 %v1898_v17, %v1891_v28 }
 0x8ae   :  { %v1906_v59 = vadd.f32 %v1902_v21, %v1886_v53  ;;  %v1908_v57 = vadd.f32 %v1902_v21, %v1888_v41  ;;  %v1910_v7 = vadd.f32 %v1902_v21, %v1890_v26  ;;  %v1912_v43 = vadd.f32 %v1902_v21, %v1892_v2  ;;  %v4070_v21 = vld [vmem:[%s5785_s3 + $0x114] ss:$8 sps:$4 sm:$0xff]   ;;  %v4068_v41 = vld [vmem:[%s5785_s3 + $0x110] ss:$8 sps:$4 sm:$0xff]  }
 0x8af   :  { %v1953_v25 = vrot.slane %v1905_v54, 7  ;;  %v1955_v5 = vrot.slane %v1907_v56, 7  ;;  %2954 = vmatpush1.bf16.msra.mxu0 %v4062_v58  ;;  %v1959_v42 = vrot.slane %v1909_v0, 7  ;;  %v1961_v46 = vrot.slane %v1911_v37, 7 }
 0x8b0   :  { %v1954_v61 = vrot.slane %v1906_v59, 7  ;;  %v1957_v16 = vrot.slane %v1908_v57, 7  ;;  %v1960_v44 = vrot.slane %v1910_v7, 7  ;;  %v1963_v39 = vrot.slane %v1912_v43, 7  ;;  %2976 = vmatprep.subr.bf16.mxu0 %v4067_v34  ;;  %v4073_v59 = vld [vmem:[%s5785_s3 + $0x124] ss:$8 sps:$4 sm:$0xff]  }
 0x8b1   :  { %1965 = vrot.lane.b32.xlu0 %v1953_v25, %s4190_s7  ;;  %v1956_v20 = vsel %vm1952_vm5, %v1953_v25, %v1955_v5  ;;  %v1962_v49 = vsel %vm1952_vm5, %v1959_v42, %v1961_v46 }
 0x8b2   :  { %1967 = vrot.lane.b32.xlu1 %v1954_v61, %s4190_s7  ;;  %v1958_v12 = vsel %vm1952_vm5, %v1954_v61, %v1957_v16  ;;  %v1964_v4 = vsel %vm1952_vm5, %v1960_v44, %v1963_v39 }
 0x8b5   :  { %1969 = vrot.lane.b32.xlu0 %v1956_v20, %s4190_s7 }
 0x8b6   :  { %1971 = vrot.lane.b32.xlu1 %v1958_v12, %s4190_s7  ;;  %v4074_v12 = vld [vmem:[%s5785_s3 + $0x130] ss:$8 sps:$4 sm:$0xff]  }
 0x8b9   :  { %1973 = vrot.lane.b32.xlu0 %v1955_v5, %s4190_s7 }
 0x8ba   :  { %1975 = vrot.lane.b32.xlu1 %v1957_v16, %s4190_s7  ;;  %v4076_v16 = vld [vmem:[%s5785_s3 + $0x134] ss:$8 sps:$4 sm:$0xff]  }
 0x8bd   :  { %1977 = vrot.lane.b32.xlu0 %v1959_v42, %s4190_s7 }
 0x8be   :  { %1979 = vrot.lane.b32.xlu1 %v1960_v44, %s4190_s7 }
 0x8c1   :  { %1981 = vrot.lane.b32.xlu0 %v1962_v49, %s4190_s7 }
 0x8c2   :  { %1983 = vrot.lane.b32.xlu1 %v1964_v4, %s4190_s7 }
 0x8c5   :  { %1985 = vrot.lane.b32.xlu0 %v1961_v46, %s4190_s7 }
 0x8c6   :  { %1987 = vrot.lane.b32.xlu1 %v1963_v39, %s4190_s7  ;;  %v4079_v39 = vld [vmem:[%s5785_s3 + $0x144] ss:$8 sps:$4 sm:$0xff]  }
 0x923   :  { %v1966_v18 = vpop.permute.xlu0 %1965 }
 0x924   :  { %2014 = vst.msk [vmem:[#allocation3] sm:$0xfe] %vm2013_vm10, %v1966_v18  ;;  %v1968_v13 = vpop.permute.xlu1 %1967 }
 0x925   :  { %v1989_v3 = vsel %vm278_vm6, %v1966_v18, %v1968_v13  ;;  %2016 = vst.msk [vmem:[#allocation3 + $0x10] sm:$0xfe] %vm1928_vm3, %v1968_v13 }
 0x926   :  { %2015 = vst [vmem:[#allocation3 + $0x8] sm:$0xfe] %v1989_v3 }
 0x927   :  { %v1970_v36 = vpop.permute.xlu0 %1969 }
 0x928   :  { %2017 = vst.msk [vmem:[#allocation3 + $0x18] sm:$0xff] %vm326_vm12, %v1970_v36  ;;  %v1972_v32 = vpop.permute.xlu1 %1971 }
 0x929   :  { %v5383_v47 = vsel %vm278_vm6, %v1970_v36, %v1972_v32  ;;  %2019 = vst.msk [vmem:[#allocation3 + $0x28] sm:$0xff] %vm278_vm6, %v1972_v32  ;;  %v4077_v36 = vld [vmem:[%s5785_s3 + $0x140] ss:$8 sps:$4 sm:$0xff]  }
 0x92a   :  { %v2079_v24 = vrot.slane %v5383_v47, 1 }
 0x92b   :  { %v1974_v9 = vpop.permute.xlu0 %1973  ;;  %v2045_v30 = vld [vmem:[#allocation3] sm:$0xfe] }
 0x92c   :  { %2021 = vst.msk [vmem:[#allocation3 + $0x30] sm:$0x1] %vm2020_vm11, %v1974_v9  ;;  %v1976_v19 = vpop.permute.xlu1 %1975  ;;  %v2033_v40 = vld [vmem:[#allocation3] sm:$0xff]  ;;  %v2075_v6 = vrot.slane %v2045_v30, 1  ;;  %v2047_v49 = vld [vmem:[#allocation3 + $0x10] sm:$0xfe] }
 0x92d   :  { %v1991_v22 = vsel %vm278_vm6, %v1974_v9, %v1976_v19  ;;  %2023 = vst.msk [vmem:[#allocation3 + $0x40] sm:$0x1] %vm1931_vm7, %v1976_v19  ;;  %v2034_v27 = vld [vmem:[#allocation3 + $0x8] sm:$0xff]  ;;  %v2105_v3 = vld [vmem:[#allocation3] sm:$0xfc] }
 0x92e   :  { %v2046_v31 = vld [vmem:[#allocation3 + $0x8] sm:$0xfe]  ;;  %2022 = vst [vmem:[#allocation3 + $0x38] sm:$0x1] %v1991_v22  ;;  %v2256_v10 = vpack.c.bf16 %v5383_v47, %v2034_v27  ;;  %v2081_v27 = vrot.slane %v2047_v49, 1 }
 0x92f   :  { %v2078_v38 = vrot.slane %v2046_v31, 1  ;;  %v1978_v45 = vpop.permute.xlu0 %1977  ;;  %v5390_v50 = vld [vmem:[#allocation3 + $0x18] sm:$0xff]  ;;  %v2106_v22 = vld [vmem:[#allocation3 + $0x8] sm:$0xfc] }
 0x930   :  { %2024 = vst.msk [vmem:[#allocation3 + $0x48] sm:$0xfe] %vm2013_vm10, %v1978_v45  ;;  %v1980_v55 = vpop.permute.xlu1 %1979  ;;  %2955 = vmatprep.mubr.bf16.mxu0 %v2256_v10  ;;  %v2255_v17 = vpack.c.bf16 %v5390_v50, %v2033_v40  ;;  %v2076_v11 = vrot.slane %v5390_v50, 1  ;;  %v5436_v7 = vld [vmem:[#allocation3 + $0x28] sm:$0xff] }
 0x931   :  { %v1992_v23 = vsel %vm278_vm6, %v1978_v45, %v1980_v55  ;;  %2026 = vst.msk [vmem:[#allocation3 + $0x58] sm:$0xfe] %vm1928_vm3, %v1980_v55  ;;  %v2080_v48 = vsel %vm366_vm14, %v2078_v38, %v2079_v24  ;;  %v2082_v13 = vrot.slane %v5436_v7, 1  ;;  %v4082_v38 = vld [vmem:[%s5785_s3 + $0x154] ss:$8 sps:$4 sm:$0xff]   ;;  %v2133_v45 = vrot.slane %v5383_v47, 2 }
 0x932   :  { %2025 = vst [vmem:[#allocation3 + $0x50] sm:$0xfe] %v1992_v23  ;;  %2956 = vmatmul.mubr.bf16.vlgmr.msra.gmra.mrb[16].mxu0 %v2255_v17  ;;  %v2077_v29 = vsel %vm366_vm14, %v2075_v6, %v2076_v11  ;;  %v2129_v55 = vrot.slane %v2105_v3, 2 }
 0x933   :  { %v1982_v52 = vpop.permute.xlu0 %1981  ;;  %v3907_v51 = vpack.i.bf16 %v2080_v48, %v2077_v29  ;;  %v2048_v53 = vld [vmem:[#allocation3 + $0x30] sm:$0x1]  ;;  %2977 = vmatpush1.bf16.msra.mxu0 %v4065_v35  ;;  %v2130_v35 = vrot.slane %v5390_v50, 2 }
 0x934   :  { %2027 = vst.msk [vmem:[#allocation3 + $0x60] sm:$0xff] %vm326_vm12, %v1982_v52  ;;  %v1984_v54 = vpop.permute.xlu1 %1983  ;;  %v2084_v56 = vrot.slane %v2048_v53, 1  ;;  %2978 = vmatprep.subr.bf16.mxu0 %v4070_v21  ;;  %v2050_v15 = vld [vmem:[#allocation3 + $0x40] sm:$0x1]  ;;  %v2108_v19 = vld [vmem:[#allocation3 + $0x30] sm:$0x3] }
 0x935   :  { %v5414_v57 = vsel %vm278_vm6, %v1982_v52, %v1984_v54  ;;  %2029 = vst.msk [vmem:[#allocation3 + $0x70] sm:$0xff] %vm278_vm6, %v1984_v54  ;;  %3908 = vrot.lane.b32.xlu0 %v3907_v51, %s4192_s30  ;;  %v2049_v62 = vld [vmem:[#allocation3 + $0x38] sm:$0x1]  ;;  %v2088_v37 = vrot.slane %v2050_v15, 1  ;;  %v2138_v6 = vrot.slane %v2108_v19, 2 }
 0x936   :  { %v2086_v60 = vrot.slane %v2049_v62, 1  ;;  %v2085_v5 = vsel %vm366_vm14, %v2076_v11, %v2084_v56  ;;  %v2094_v43 = vrot.slane %v5414_v57, 1  ;;  %v2109_v4 = vld [vmem:[#allocation3 + $0x38] sm:$0x3]  ;;  %v2132_v11 = vrot.slane %v2106_v22, 2 }
 0x937   :  { %v1986_v25 = vpop.permute.xlu0 %1985  ;;  %2979 = vmatpush1.bf16.msra.mxu0 %v4068_v41  ;;  %v2051_v8 = vld [vmem:[#allocation3 + $0x48] sm:$0xfe]  ;;  %v2089_v30 = vsel %vm366_vm14, %v2082_v13, %v2088_v37  ;;  %v2140_v10 = vrot.slane %v2109_v4, 2  ;;  %v4080_v21 = vld [vmem:[%s5785_s3 + $0x150] ss:$8 sps:$4 sm:$0xff]   ;;  %v2131_v56 = vsel %vm403_vm13, %v2129_v55, %v2130_v35 }
 0x938   :  { %2030 = vst.msk [vmem:[#allocation3 + $0x78] sm:$0x1] %vm2020_vm11, %v1986_v25  ;;  %v1988_v61 = vpop.permute.xlu1 %1987  ;;  %v2087_v14 = vsel %vm366_vm14, %v2079_v24, %v2086_v60  ;;  %2980 = vmatprep.subr.bf16.mxu0 %v4073_v59  ;;  %v2039_v2 = vld [vmem:[#allocation3 + $0x48] sm:$0xff]  ;;  %v2090_v46 = vrot.slane %v2051_v8, 1  ;;  %v2083_v24 = vsel %vm366_vm14, %v2081_v27, %v2082_v13  ;;  %v2110_v62 = vld [vmem:[#allocation3 + $0x40] sm:$0x3]  ;;  %v2139_v60 = vsel %vm403_vm13, %v2130_v35, %v2138_v6 }
 0x939   :  { %v1994_v33 = vsel %vm278_vm6, %v1986_v25, %v1988_v61  ;;  %2032 = vst.msk [vmem:[#allocation3 + $0x88] sm:$0x1] %vm1931_vm7, %v1988_v61  ;;  %v3912_v58 = vpack.i.bf16 %v2087_v14, %v2085_v5  ;;  %v2040_v63 = vld [vmem:[#allocation3 + $0x50] sm:$0xff]  ;;  %v3927_v23 = vpack.i.bf16 %v2089_v30, %v2083_v24  ;;  %v2111_v29 = vld [vmem:[#allocation3 + $0x48] sm:$0xfc]  ;;  %v2141_v53 = vsel %vm403_vm13, %v2133_v45, %v2140_v10 }
 0x93a   :  { %v2052_v20 = vld [vmem:[#allocation3 + $0x50] sm:$0xfe]  ;;  %2031 = vst [vmem:[#allocation3 + $0x80] sm:$0x1] %v1994_v33  ;;  %v2263_v26 = vpack.c.bf16 %v5414_v57, %v2040_v63  ;;  %v4085_v41 = vld [vmem:[%s5785_s3 + $0x164] ss:$8 sps:$4 sm:$0xff]   ;;  %v3937_v5 = vpack.i.bf16 %v2141_v53, %v2139_v60  ;;  %v2134_v14 = vsel %vm403_vm13, %v2132_v11, %v2133_v45 }
 0x93b   :  { %v2093_v28 = vrot.slane %v2052_v20, 1  ;;  %3913 = vrot.lane.b32.xlu1 %v3912_v58, %s4192_s30  ;;  %v5434_v0 = vld [vmem:[#allocation3 + $0x60] sm:$0xff]  ;;  %2981 = vmatpush1.bf16.msra.mxu0 %v4071_v1  ;;  %v2112_v48 = vld [vmem:[#allocation3 + $0x50] sm:$0xfc]  ;;  %v2144_v25 = vrot.slane %v2111_v29, 2  ;;  %v2148_v58 = vrot.slane %v5414_v57, 2 }
 0x93c   :  { %2965 = vmatprep.mubr.bf16.mxu0 %v2263_v26  ;;  %v2091_v42 = vrot.slane %v5434_v0, 1  ;;  %v2262_v44 = vpack.c.bf16 %v5434_v0, %v2039_v2  ;;  %2982 = vmatprep.subr.bf16.mxu0 %v4076_v16  ;;  %v2145_v47 = vrot.slane %v5434_v0, 2  ;;  %v5470_v59 = vld [vmem:[#allocation3 + $0x70] sm:$0xff]  ;;  %v2147_v1 = vrot.slane %v2112_v48, 2  ;;  %v2053_v15 = vld [vmem:[#allocation3 + $0x58] sm:$0xfe] }
 0x93d   :  { %v2095_v18 = vsel %vm366_vm14, %v2093_v28, %v2094_v43  ;;  %v4083_v33 = vld [vmem:[%s5785_s3 + $0x160] ss:$8 sps:$4 sm:$0xff]   ;;  %v2097_v8 = vrot.slane %v5470_v59, 1  ;;  %v2142_v20 = vrot.slane %v2110_v62, 2  ;;  %v4088_v26 = vld [vmem:[%s5785_s3 + $0x174] ss:$8 sps:$4 sm:$0xff]   ;;  %v3932_v28 = vpack.i.bf16 %v2134_v14, %v2131_v56 }
 0x93e   :  { %2966 = vmatmul.mubr.bf16.gmra.mrb[20].mxu0 %v2262_v44  ;;  %v2092_v34 = vsel %vm366_vm14, %v2090_v46, %v2091_v42  ;;  %v2146_v63 = vsel %vm403_vm13, %v2144_v25, %v2145_v47  ;;  %v2136_v2 = vrot.slane %v5436_v7, 2  ;;  %v2149_v37 = vsel %vm403_vm13, %v2147_v1, %v2148_v58  ;;  %v4091_v13 = vld [vmem:[%s5785_s3 + $0x184] ss:$8 sps:$4 sm:$0xff]   ;;  %v2113_v22 = vld [vmem:[#allocation3 + $0x58] sm:$0xfc] }
 0x93f   :  { %v3917_v32 = vpack.i.bf16 %v2095_v18, %v2092_v34  ;;  %v2054_v9 = vld [vmem:[#allocation3 + $0x78] sm:$0x1]  ;;  %2983 = vmatpush1.bf16.msra.mxu0 %v4074_v12  ;;  %v2107_v12 = vld [vmem:[#allocation3 + $0x10] sm:$0xfc]  ;;  %v2096_v57 = vrot.slane %v2053_v15, 1  ;;  %v3947_v44 = vpack.i.bf16 %v2149_v37, %v2146_v63  ;;  %v2150_v45 = vrot.slane %v2113_v22, 2 }
 0x940   :  { %v2099_v31 = vrot.slane %v2054_v9, 1  ;;  %2984 = vmatprep.subr.bf16.mxu0 %v4079_v39  ;;  %v2056_v52 = vld [vmem:[#allocation3 + $0x88] sm:$0x1]  ;;  %v2114_v0 = vld [vmem:[#allocation3 + $0x78] sm:$0x3]  ;;  %v2135_v4 = vrot.slane %v2107_v12, 2  ;;  %v2143_v34 = vsel %vm403_vm13, %v2136_v2, %v2142_v20 }
 0x941   :  { %3918 = vrot.lane.b32.xlu0 %v3917_v32, %s4192_s30  ;;  %v2055_v40 = vld [vmem:[#allocation3 + $0x80] sm:$0x1]  ;;  %v2103_v61 = vrot.slane %v2056_v52, 1  ;;  %v2116_v46 = vld [vmem:[#allocation3 + $0x88] sm:$0x3]  ;;  %v2098_v49 = vsel %vm366_vm14, %v2096_v57, %v2097_v8  ;;  %v2153_v18 = vrot.slane %v2114_v0, 2 }
 0x942   :  { %v2101_v17 = vrot.slane %v2055_v40, 1  ;;  %v2100_v51 = vsel %vm366_vm14, %v2091_v42, %v2099_v31  ;;  %v2115_v16 = vld [vmem:[#allocation3 + $0x80] sm:$0x3]  ;;  %v4086_v39 = vld [vmem:[%s5785_s3 + $0x170] ss:$8 sps:$4 sm:$0xff]   ;;  %v2157_v9 = vrot.slane %v2116_v46, 2 }
 0x943   :  { %2985 = vmatpush1.bf16.msra.mxu0 %v4077_v36  ;;  %v2155_v42 = vrot.slane %v2115_v16, 2  ;;  %v2137_v36 = vsel %vm403_vm13, %v2135_v4, %v2136_v2  ;;  %v4089_v27 = vld [vmem:[%s5785_s3 + $0x180] ss:$8 sps:$4 sm:$0xff]   ;;  %v2154_v30 = vsel %vm403_vm13, %v2145_v47, %v2153_v18  ;;  %v2151_v31 = vrot.slane %v5470_v59, 2  ;;  %v4094_v10 = vld [vmem:[%s5785_s3 + $0x194] ss:$8 sps:$4 sm:$0xff]  }
 0x944   :  { %v2102_v50 = vsel %vm366_vm14, %v2094_v43, %v2101_v17  ;;  %2986 = vmatprep.subr.bf16.mxu0 %v4082_v38  ;;  %v2104_v43 = vsel %vm366_vm14, %v2097_v8, %v2103_v61  ;;  %v3957_v19 = vpack.i.bf16 %v2143_v34, %v2137_v36  ;;  %v4092_v35 = vld [vmem:[%s5785_s3 + $0x190] ss:$8 sps:$4 sm:$0xff]   ;;  %v4097_v24 = vld [vmem:[%s5785_s3 + $0x1a4] ss:$8 sps:$4 sm:$0xff]   ;;  %v4095_v6 = vld [vmem:[%s5785_s3 + $0x1a0] ss:$8 sps:$4 sm:$0xff]  }
 0x945   :  { %3928 = vrot.lane.b32.xlu0 %v3927_v23, %s4192_s30  ;;  %v3922_v54 = vpack.i.bf16 %v2102_v50, %v2100_v51  ;;  %v3942_v3 = vpack.i.bf16 %v2104_v43, %v2098_v49  ;;  %v2156_v32 = vsel %vm403_vm13, %v2148_v58, %v2155_v42  ;;  %v2158_v40 = vsel %vm403_vm13, %v2151_v31, %v2157_v9  ;;  %v4100_v11 = vld [vmem:[%s5785_s3 + $0x1b4] ss:$8 sps:$4 sm:$0xff]   ;;  %v4103_v23 = vld [vmem:[%s5785_s3 + $0x1c4] ss:$8 sps:$4 sm:$0xff]   ;;  %v4101_v29 = vld [vmem:[%s5785_s3 + $0x1c0] ss:$8 sps:$4 sm:$0xff]  }
 0x946   :  { %v3952_v38 = vpack.i.bf16 %v2156_v32, %v2154_v30  ;;  %v2152_v55 = vsel %vm403_vm13, %v2150_v45, %v2151_v31  ;;  %v4106_v48 = vld [vmem:[%s5785_s3 + $0x1d4] ss:$8 sps:$4 sm:$0xff]   ;;  %v4104_v52 = vld [vmem:[%s5785_s3 + $0x1d0] ss:$8 sps:$4 sm:$0xff]   ;;  %v4109_v47 = vld [vmem:[%s5785_s3 + $0x1e4] ss:$8 sps:$4 sm:$0xff]  }
 0x947   :  { %3923 = vrot.lane.b32.xlu1 %v3922_v54, %s4192_s30  ;;  %2987 = vmatpush1.bf16.msra.mxu0 %v4080_v21  ;;  %v3962_v17 = vpack.i.bf16 %v2158_v40, %v2152_v55  ;;  %v4098_v21 = vld [vmem:[%s5785_s3 + $0x1b0] ss:$8 sps:$4 sm:$0xff]   ;;  %v4107_v51 = vld [vmem:[%s5785_s3 + $0x1e0] ss:$8 sps:$4 sm:$0xff]   ;;  %v4112_v50 = vld [vmem:[%s5785_s3 + $0x1f4] ss:$8 sps:$4 sm:$0xff]  }
 0x948   :  { %2988 = vmatprep.subr.bf16.mxu0 %v4085_v41  ;;  %v4110_v53 = vld [vmem:[%s5785_s3 + $0x1f0] ss:$8 sps:$4 sm:$0xff]   ;;  %v4115_v41 = vld [vmem:[%s5785_s3 + $0x204] ss:$8 sps:$4 sm:$0xff]   ;;  %v4113_v63 = vld [vmem:[%s5785_s3 + $0x200] ss:$8 sps:$4 sm:$0xff]  }
 0x949   :  { %3938 = vrot.lane.b32.xlu0 %v3937_v5, %s4191_s4  ;;  %v2035_v61 = vld [vmem:[#allocation3 + $0x10] sm:$0xff]  ;;  %v4119_v37 = vld [vmem:[%s5785_s3 + $0x220] ss:$8 sps:$4 sm:$0xff]   ;;  %v4127_v31 = vld [vmem:[%s5785_s3 + $0x244] ss:$8 sps:$4 sm:$0xff]  }
 0x94a   :  { %v4118_v8 = vld [vmem:[%s5785_s3 + $0x214] ss:$8 sps:$4 sm:$0xff]  }
 0x94b   :  { %3933 = vrot.lane.b32.xlu1 %v3932_v28, %s4191_s4  ;;  %2989 = vmatpush1.bf16.msra.mxu0 %v4083_v33  ;;  %v4124_v42 = vld [vmem:[%s5785_s3 + $0x234] ss:$8 sps:$4 sm:$0xff]  }
 0x94c   :  { %2990 = vmatprep.subr.bf16.mxu0 %v4088_v26  ;;  %v4121_v26 = vld [vmem:[%s5785_s3 + $0x224] ss:$8 sps:$4 sm:$0xff]  }
 0x94d   :  { %3948 = vrot.lane.b32.xlu0 %v3947_v44, %s4191_s4  ;;  %v2041_v44 = vld [vmem:[#allocation3 + $0x58] sm:$0xff] }
 0x94f   :  { %3943 = vrot.lane.b32.xlu1 %v3942_v3, %s4192_s30  ;;  %2991 = vmatpush1.bf16.msra.mxu0 %v4086_v39 }
 0x950   :  { %2992 = vmatprep.subr.bf16.mxu0 %v4091_v13 }
 0x951   :  { %3958 = vrot.lane.b32.xlu0 %v3957_v19, %s4191_s4  ;;  %v4122_v19 = vld [vmem:[%s5785_s3 + $0x230] ss:$8 sps:$4 sm:$0xff]  }
 0x953   :  { %3953 = vrot.lane.b32.xlu1 %v3952_v38, %s4191_s4  ;;  %2993 = vmatpush1.bf16.msra.mxu0 %v4089_v27 }
 0x954   :  { %2994 = vmatprep.subr.bf16.mxu0 %v4094_v10 }
 0x957   :  { %3963 = vrot.lane.b32.xlu1 %v3962_v17, %s4191_s4  ;;  %2995 = vmatpush1.bf16.msra.mxu0 %v4092_v35  ;;  %v4125_v17 = vld [vmem:[%s5785_s3 + $0x240] ss:$8 sps:$4 sm:$0xff]  }
 0x958   :  { %2996 = vmatprep.subr.bf16.mxu0 %v4097_v24 }
 0x95b   :  { %2997 = vmatpush1.bf16.msra.mxu0 %v4095_v6 }
 0x95c   :  { %2998 = vmatprep.subr.bf16.mxu0 %v4100_v11  ;;  %v4130_v11 = vld [vmem:[%s5785_s3 + $0x254] ss:$8 sps:$4 sm:$0xff]  }
 0x95f   :  { %2999 = vmatpush1.bf16.msra.mxu0 %v4098_v21 }
 0x960   :  { %3000 = vmatprep.subr.bf16.mxu0 %v4103_v23 }
 0x963   :  { %3001 = vmatpush1.bf16.msra.mxu0 %v4101_v29 }
 0x964   :  { %3002 = vmatprep.subr.bf16.mxu0 %v4106_v48  ;;  %v4128_v48 = vld [vmem:[%s5785_s3 + $0x250] ss:$8 sps:$4 sm:$0xff]  }
 0x967   :  { %3003 = vmatpush1.bf16.msra.mxu0 %v4104_v52 }
 0x968   :  { %3004 = vmatprep.subr.bf16.mxu0 %v4109_v47 }
 0x96b   :  { %3005 = vmatpush1.bf16.msra.mxu0 %v4107_v51  ;;  %v4133_v51 = vld [vmem:[%s5785_s3 + $0x264] ss:$8 sps:$4 sm:$0xff]  }
 0x96c   :  { %3006 = vmatprep.subr.bf16.mxu0 %v4112_v50 }
 0x96f   :  { %3007 = vmatpush1.bf16.msra.mxu0 %v4110_v53  ;;  %v4131_v53 = vld [vmem:[%s5785_s3 + $0x260] ss:$8 sps:$4 sm:$0xff]  }
 0x970   :  { %3029 = vmatprep.subr.bf16.mxu0 %v4115_v41  ;;  %v4136_v41 = vld [vmem:[%s5785_s3 + $0x274] ss:$8 sps:$4 sm:$0xff]  }
 0x9a7   :  { %v3909_v54 = vpop.permute.xlu0 %3908 }
 0x9a8   :  { %v3911_v56 = vunpack.i.h.bf16 %v3909_v54  ;;  %v3910_v62 = vunpack.i.l.bf16 %v3909_v54  ;;  %v4134_v54 = vld [vmem:[%s5785_s3 + $0x270] ss:$8 sps:$4 sm:$0xff]  }
 0x9aa   :  { %v2247_v5 = vsel %vm522_vm1, %v2035_v61, %v3910_v62  ;;  %v2183_v15 = vsel %vm522_vm1, %v3910_v62, %v3911_v56  ;;  %v4137_v62 = vld [vmem:[%s5785_s3 + $0x280] ss:$8 sps:$4 sm:$0xff]  }
 0x9ab   :  { %v4143_v61 = vld [vmem:[%s5785_s3 + $0x2a0] ss:$8 sps:$4 sm:$0xff]  }
 0x9ad   :  { %v3914_v60 = vpop.permute.xlu1 %3913 }
 0x9ae   :  { %v3916_v25 = vunpack.i.h.bf16 %v3914_v60  ;;  %v3915_v1 = vunpack.i.l.bf16 %v3914_v60  ;;  %v4142_v60 = vld [vmem:[%s5785_s3 + $0x294] ss:$8 sps:$4 sm:$0xff]  }
 0x9b0   :  { %v2248_v14 = vsel %vm522_vm1, %v5436_v7, %v3915_v1  ;;  %v2185_v16 = vsel %vm522_vm1, %v3915_v1, %v3916_v25  ;;  %v4116_v7 = vld [vmem:[%s5785_s3 + $0x210] ss:$8 sps:$4 sm:$0xff]   ;;  %v4145_v1 = vld [vmem:[%s5785_s3 + $0x2a4] ss:$8 sps:$4 sm:$0xff]  }
 0x9b1   :  { %v2257_v33 = vpack.c.bf16 %v2248_v14, %v2247_v5  ;;  %v2258_v58 = vpack.c.bf16 %v2185_v16, %v2183_v15  ;;  %v4148_v5 = vld [vmem:[%s5785_s3 + $0x2b4] ss:$8 sps:$4 sm:$0xff]   ;;  %v4146_v14 = vld [vmem:[%s5785_s3 + $0x2b0] ss:$8 sps:$4 sm:$0xff]   ;;  %v4151_v15 = vld [vmem:[%s5785_s3 + $0x2c4] ss:$8 sps:$4 sm:$0xff]  }
 0x9b2   :  { %v4149_v16 = vld [vmem:[%s5785_s3 + $0x2c0] ss:$8 sps:$4 sm:$0xff]  }
 0x9b3   :  { %3008 = vmatprep.mubr.bf16.mxu0 %v2258_v58  ;;  %v5567_v20 = vpop.permute.xlu0 %3918 }
 0x9b4   :  { %3009 = vmatmul.mubr.bf16.vlgmr.msra.gmra.mrb[16].mxu0 %v2257_v33  ;;  %v3921_v28 = vunpack.i.h.bf16 %v5567_v20  ;;  %v3920_v12 = vunpack.i.l.bf16 %v5567_v20  ;;  %v4154_v33 = vld [vmem:[%s5785_s3 + $0x2d4] ss:$8 sps:$4 sm:$0xff]   ;;  %v4167_v20 = vld [vmem:[%s5785_s3 + $0x320] ss:$8 sps:$4 sm:$0xff]  }
 0x9b5   :  { %3030 = vmatpush1.bf16.msra.mxu0 %v4113_v63  ;;  %v4152_v63 = vld [vmem:[%s5785_s3 + $0x2d0] ss:$8 sps:$4 sm:$0xff]  }
 0x9b6   :  { %3031 = vmatprep.subr.bf16.mxu0 %v4118_v8  ;;  %v2187_v4 = vsel %vm522_vm1, %v3920_v12, %v3921_v28  ;;  %v2249_v34 = vsel %vm522_vm1, %v2041_v44, %v3920_v12  ;;  %v4157_v8 = vld [vmem:[%s5785_s3 + $0x2e4] ss:$8 sps:$4 sm:$0xff]   ;;  %v4160_v12 = vld [vmem:[%s5785_s3 + $0x2f4] ss:$8 sps:$4 sm:$0xff]  }
 0x9b7   :  { %v3929_v2 = vpop.permute.xlu0 %3928 }
 0x9b8   :  { %v3931_v46 = vunpack.i.h.bf16 %v3929_v2  ;;  %v3930_v39 = vunpack.i.l.bf16 %v3929_v2 }
 0x9b9   :  { %3032 = vmatpush1.bf16.msra.mxu0 %v4116_v7  ;;  %v5577_v0 = vpop.permute.xlu1 %3923 }
 0x9ba   :  { %v3926_v57 = vunpack.i.h.bf16 %v5577_v0  ;;  %v3925_v43 = vunpack.i.l.bf16 %v5577_v0  ;;  %3033 = vmatprep.subr.bf16.mxu0 %v4121_v26  ;;  %v2186_v10 = vsel %vm522_vm1, %v3916_v25, %v3931_v46  ;;  %v2184_v38 = vsel %vm522_vm1, %v3911_v56, %v3930_v39  ;;  %v4139_v56 = vld [vmem:[%s5785_s3 + $0x284] ss:$8 sps:$4 sm:$0xff]   ;;  %v4140_v25 = vld [vmem:[%s5785_s3 + $0x290] ss:$8 sps:$4 sm:$0xff]   ;;  %v4155_v26 = vld [vmem:[%s5785_s3 + $0x2e0] ss:$8 sps:$4 sm:$0xff]  }
 0x9bb   :  { %v3939_v49 = vpop.permute.xlu0 %3938  ;;  %v4163_v46 = vld [vmem:[%s5785_s3 + $0x304] ss:$8 sps:$4 sm:$0xff]   ;;  %v4170_v0 = vld [vmem:[%s5785_s3 + $0x330] ss:$8 sps:$4 sm:$0xff]  }
 0x9bc   :  { %v3941_v18 = vunpack.i.h.bf16 %v3939_v49  ;;  %v3940_v13 = vunpack.i.l.bf16 %v3939_v49  ;;  %v2189_v3 = vsel %vm522_vm1, %v3925_v43, %v3926_v57  ;;  %v2250_v36 = vsel %vm522_vm1, %v5470_v59, %v3925_v43  ;;  %v4158_v43 = vld [vmem:[%s5785_s3 + $0x2f0] ss:$8 sps:$4 sm:$0xff]   ;;  %v4161_v49 = vld [vmem:[%s5785_s3 + $0x300] ss:$8 sps:$4 sm:$0xff]  }
 0x9bd   :  { %3034 = vmatpush1.bf16.msra.mxu0 %v4119_v37  ;;  %v3934_v32 = vpop.permute.xlu1 %3933  ;;  %v2265_v9 = vpack.c.bf16 %v2189_v3, %v2187_v4  ;;  %v2264_v22 = vpack.c.bf16 %v2250_v36, %v2249_v34  ;;  %v4164_v36 = vld [vmem:[%s5785_s3 + $0x310] ss:$8 sps:$4 sm:$0xff]  }
 0x9be   :  { %v3936_v27 = vunpack.i.h.bf16 %v3934_v32  ;;  %v3935_v30 = vunpack.i.l.bf16 %v3934_v32  ;;  %3035 = vmatprep.subr.bf16.mxu0 %v4124_v42  ;;  %v5610_v40 = vsel %vm551_vm2, %v2186_v10, %v3940_v13  ;;  %v2229_v55 = vsel %vm551_vm2, %v3940_v13, %v3941_v18  ;;  %v4166_v13 = vld [vmem:[%s5785_s3 + $0x314] ss:$8 sps:$4 sm:$0xff]   ;;  %v4173_v10 = vld [vmem:[%s5785_s3 + $0x340] ss:$8 sps:$4 sm:$0xff]  }
 0x9bf   :  { %3018 = vmatprep.mubr.bf16.mxu0 %v2265_v9  ;;  %v5604_v59 = vpop.permute.xlu0 %3948 }
 0x9c0   :  { %v5607_v45 = vsel %vm551_vm2, %v2184_v38, %v3935_v30  ;;  %3019 = vmatmul.mubr.bf16.gmra.mrb[20].mxu0 %v2264_v22  ;;  %v2227_v35 = vsel %vm551_vm2, %v3935_v30, %v3936_v27  ;;  %v3951_v42 = vunpack.i.h.bf16 %v5604_v59  ;;  %v3950_v44 = vunpack.i.l.bf16 %v5604_v59  ;;  %v4178_v38 = vld [vmem:[%s5785_s3 + $0x354] ss:$8 sps:$4 sm:$0xff]   ;;  %v4176_v59 = vld [vmem:[%s5785_s3 + $0x350] ss:$8 sps:$4 sm:$0xff]  }
 0x9c1   :  { %v2259_v24 = vpack.c.bf16 %v5610_v40, %v5607_v45  ;;  %3036 = vmatpush1.bf16.msra.mxu0 %v4122_v19  ;;  %v2260_v6 = vpack.c.bf16 %v2229_v55, %v2227_v35  ;;  %v3944_v58 = vpop.permute.xlu1 %3943  ;;  %v4169_v19 = vld [vmem:[%s5785_s3 + $0x324] ss:$8 sps:$4 sm:$0xff]  }
 0x9c2   :  { %3037 = vmatprep.subr.bf16.mxu0 %v4127_v31  ;;  %v3946_v4 = vunpack.i.h.bf16 %v3944_v58  ;;  %v3945_v34 = vunpack.i.l.bf16 %v3944_v58  ;;  %v4175_v31 = vld [vmem:[%s5785_s3 + $0x344] ss:$8 sps:$4 sm:$0xff]  }
 0x9c3   :  { %3061 = vmatprep.mubr.bf16.mxu0 %v2260_v6  ;;  %v3959_v21 = vpop.permute.xlu0 %3958 }
 0x9c4   :  { %v3961_v23 = vunpack.i.h.bf16 %v3959_v21  ;;  %v3960_v29 = vunpack.i.l.bf16 %v3959_v21  ;;  %v2188_v32 = vsel %vm522_vm1, %v3921_v28, %v3945_v34  ;;  %v2190_v9 = vsel %vm522_vm1, %v3926_v57, %v3946_v4  ;;  %v4172_v28 = vld [vmem:[%s5785_s3 + $0x334] ss:$8 sps:$4 sm:$0xff]  }
 0x9c5   :  { %3038 = vmatpush1.bf16.msra.mxu0 %v4125_v17  ;;  %v3954_v7 = vpop.permute.xlu1 %3953  ;;  %v4194_v57 = vmov 0  }
 0x9c6   :  { %v5626_v52 = vsel %vm551_vm2, %v3936_v27, %v3960_v29  ;;  %v5629_v47 = vsel %vm551_vm2, %v3941_v18, %v3961_v23  ;;  %3039 = vmatprep.subr.bf16.mxu0 %v4130_v11  ;;  %v3956_v2 = vunpack.i.h.bf16 %v3954_v7  ;;  %v3955_v37 = vunpack.i.l.bf16 %v3954_v7 }
 0x9c7   :  { %v2261_v50 = vpack.c.bf16 %v5629_v47, %v5626_v52  ;;  %v2231_v18 = vsel %vm551_vm2, %v3950_v44, %v3951_v42  ;;  %v2253_v27 = vsel %vm551_vm2, %v2188_v32, %v3950_v44 }
 0x9c8   :  { %v2233_v39 = vsel %vm551_vm2, %v3955_v37, %v3956_v2  ;;  %v2254_v22 = vsel %vm551_vm2, %v2190_v9, %v3955_v37 }
 0x9c9   :  { %3040 = vmatpush1.bf16.msra.mxu0 %v4128_v48  ;;  %v2267_v3 = vpack.c.bf16 %v2233_v39, %v2231_v18  ;;  %v2266_v30 = vpack.c.bf16 %v2254_v22, %v2253_v27  ;;  %v3964_v45 = vpop.permute.xlu1 %3963 }
 0x9ca   :  { %3041 = vmatprep.subr.bf16.mxu0 %v4133_v51  ;;  %v3966_v40 = vunpack.i.h.bf16 %v3964_v45  ;;  %v3965_v35 = vunpack.i.l.bf16 %v3964_v45 }
 0x9cc   :  { %v2232_v55 = vsel %vm551_vm2, %v3951_v42, %v3965_v35 }
 0x9cd   :  { %3042 = vmatpush1.bf16.msra.mxu0 %v4131_v53 }
 0x9ce   :  { %3043 = vmatprep.subr.bf16.mxu0 %v4136_v41 }
 0x9d1   :  { %3044 = vmatpush1.bf16.msra.mxu0 %v4134_v54 }
 0x9d2   :  { %3045 = vmatprep.subr.bf16.mxu0 %v4139_v56 }
 0x9d5   :  { %3046 = vmatpush1.bf16.msra.mxu0 %v4137_v62 }
 0x9d6   :  { %3047 = vmatprep.subr.bf16.mxu0 %v4142_v60 }
 0x9d9   :  { %3048 = vmatpush1.bf16.msra.mxu0 %v4140_v25 }
 0x9da   :  { %3049 = vmatprep.subr.bf16.mxu0 %v4145_v1 }
 0x9dd   :  { %3050 = vmatpush1.bf16.msra.mxu0 %v4143_v61 }
 0x9de   :  { %3051 = vmatprep.subr.bf16.mxu0 %v4148_v5 }
 0x9e1   :  { %3052 = vmatpush1.bf16.msra.mxu0 %v4146_v14 }
 0x9e2   :  { %3053 = vmatprep.subr.bf16.mxu0 %v4151_v15 }
 0x9e5   :  { %3054 = vmatpush1.bf16.msra.mxu0 %v4149_v16 }
 0x9e6   :  { %3055 = vmatprep.subr.bf16.mxu0 %v4154_v33 }
 0x9e9   :  { %3056 = vmatpush1.bf16.msra.mxu0 %v4152_v63 }
 0x9ea   :  { %3057 = vmatprep.subr.bf16.mxu0 %v4157_v8 }
 0x9ed   :  { %3058 = vmatpush1.bf16.msra.mxu0 %v4155_v26 }
 0x9ee   :  { %3059 = vmatprep.subr.bf16.mxu0 %v4160_v12 }
 0x9f1   :  { %3060 = vmatpush1.bf16.msra.mxu0 %v4158_v43 }
 0x9f2   :  { %3082 = vmatprep.subr.bf16.mxu0 %v4163_v46 }
 0x9f4   :  { %3062 = vmatmul.mubr.bf16.vlgmr.msra.gmra.mrb[16].mxu0 %v2259_v24  ;;  %v2234_v24 = vsel %vm551_vm2, %v3956_v2, %v3966_v40 }
 0x9f5   :  { %3071 = vmatprep.mubr.bf16.mxu0 %v2267_v3  ;;  %3083 = vmatpush1.bf16.msra.mxu0 %v4161_v49  ;;  %v2268_v17 = vpack.c.bf16 %v2234_v24, %v2232_v55 }
 0x9f6   :  { %3084 = vmatprep.subr.bf16.mxu0 %v4166_v13 }
 0x9f9   :  { %3085 = vmatpush1.bf16.msra.mxu0 %v4164_v36 }
 0x9fa   :  { %3086 = vmatprep.subr.bf16.mxu0 %v4169_v19 }
 0x9fc   :  { %3072 = vmatmul.mubr.bf16.gmra.mrb[20].mxu0 %v2266_v30 }
 0x9fd   :  { %3087 = vmatpush1.bf16.msra.mxu0 %v4167_v20  ;;  %3114 = vmatprep.mubr.bf16.mxu0 %v4194_v57 }
 0x9fe   :  { %3088 = vmatprep.subr.bf16.mxu0 %v4172_v28 }
 0xa01   :  { %3089 = vmatpush1.bf16.msra.mxu0 %v4170_v0 }
 0xa02   :  { %3090 = vmatprep.subr.bf16.mxu0 %v4175_v31 }
 0xa05   :  { %3091 = vmatpush1.bf16.msra.mxu0 %v4173_v10 }
 0xa06   :  { %3092 = vmatprep.subr.bf16.mxu0 %v4178_v38 }
 0xa09   :  { %3093 = vmatpush1.bf16.msra.mxu0 %v4176_v59 }
 0xa0c   :  { %3341 = vmatmul.mubr.msk.bf16.vlgmr.msra.gmra.mrb[16].mxu0 %vm580_vm4, %v2261_v50 }
 0xa0d   :  { %3124 = vmatprep.mubr.bf16.mxu0 %v4194_v57 }
 0xa14   :  { %3342 = vmatmul.mubr.msk.bf16.gmra.mrb[20].mxu0 %vm580_vm4, %v2268_v17 }
 0xadf   :  { %v3116_v6 = vpop.f32.mrb[16].mxu0 }
 0xae0   :  { %vm3135_vm6 = vcmp.gt.f32.partialorder %v3116_v6, 0.0  ;;  %v3143_v11 = vmul.f32 0.2, %v3116_v6  ;;  %v3118_v21 = vpop.f32.mrb[17].mxu0 }
 0xae1   :  { %vm3136_vm12 = vcmp.gt.f32.partialorder %v3118_v21, 0.0  ;;  %v3144_v23 = vmul.f32 0.2, %v3118_v21  ;;  %v3120_v29 = vpop.f32.mrb[18].mxu0 }
 0xae2   :  { %v3151_v48 = vsel %vm3135_vm6, %v3116_v6, %v3143_v11  ;;  %vm3137_vm13 = vcmp.gt.f32.partialorder %v3120_v29, 0.0  ;;  %v3145_v52 = vmul.f32 0.2, %v3120_v29  ;;  %v3122_v47 = vpop.f32.mrb[19].mxu0 }
 0xae3   :  { %3159 = vst [vmem:[%s5788_s13] sm:$0xff] %v3151_v48  ;;  %v3152_v51 = vsel %vm3136_vm12, %v3118_v21, %v3144_v23  ;;  %vm3138_vm14 = vcmp.gt.f32.partialorder %v3122_v47, 0.0  ;;  %v3146_v50 = vmul.f32 0.2, %v3122_v47 }
 0xae4   :  { %3160 = vst [vmem:[%s5788_s13 + $0x8] sm:$0xff] %v3152_v51  ;;  %v3153_v53 = vsel %vm3137_vm13, %v3120_v29, %v3145_v52 }
 0xae5   :  { %3161 = vst [vmem:[%s5788_s13 + $0x10] sm:$0xff] %v3153_v53  ;;  %v3154_v41 = vsel %vm3138_vm14, %v3122_v47, %v3146_v50 }
 0xae6   :  { %3162 = vst [vmem:[%s5788_s13 + $0x18] sm:$0xff] %v3154_v41 }
 0xae7   :  { %v3126_v54 = vpop.f32.mrb[20].mxu0 }
 0xae8   :  { %vm3139_vm1 = vcmp.gt.f32.partialorder %v3126_v54, 0.0  ;;  %v3147_v56 = vmul.f32 0.2, %v3126_v54  ;;  %v3128_v62 = vpop.f32.mrb[21].mxu0 }
 0xae9   :  { %vm3140_vm2 = vcmp.gt.f32.partialorder %v3128_v62, 0.0  ;;  %v3148_v60 = vmul.f32 0.2, %v3128_v62  ;;  %v3130_v25 = vpop.f32.mrb[22].mxu0 }
 0xaea   :  { %v3155_v1 = vsel %vm3139_vm1, %v3126_v54, %v3147_v56  ;;  %vm3141_vm4 = vcmp.gt.f32.partialorder %v3130_v25, 0.0  ;;  %v3149_v61 = vmul.f32 0.2, %v3130_v25  ;;  %v3132_v5 = vpop.f32.mrb[23].mxu0 }
 0xaeb   :  { %3163 = vst [vmem:[%s5788_s13 + $0x20] sm:$0xff] %v3155_v1  ;;  %v3156_v14 = vsel %vm3140_vm2, %v3128_v62, %v3148_v60  ;;  %vm3142_vm15 = vcmp.gt.f32.partialorder %v3132_v5, 0.0  ;;  %v3150_v15 = vmul.f32 0.2, %v3132_v5 }
 0xaec   :  { %3164 = vst [vmem:[%s5788_s13 + $0x28] sm:$0xff] %v3156_v14  ;;  %v3157_v16 = vsel %vm3141_vm4, %v3130_v25, %v3149_v61 }
 0xaed   :  { %3165 = vst [vmem:[%s5788_s13 + $0x30] sm:$0xff] %v3157_v16  ;;  %v3158_v33 = vsel %vm3142_vm15, %v3132_v5, %v3150_v15 }
 0xaee   :  { %3166 = vst [vmem:[%s5788_s13 + $0x38] sm:$0xff] %v3158_v33 }

</bundles_post_ra>
